<compile_context>
chip_gen: v5e
topology: v5e:2x2
jax: 0.10.0
libtpu: 0.0.40
codegen_flags: <defaults>
</compile_context>

<pallas_src>
import functools

import numpy as np
import jax
import jax.numpy as jnp
from jax.experimental import pallas as pl
from jax.experimental.pallas import tpu as pltpu

MATMUL_DTYPE = jnp.bfloat16   # MXU input dtype for the dense Linear / MLP matmuls
LN_EPS = 1e-6


# ----------------------------------------------------------------------------
# Small helpers
# ----------------------------------------------------------------------------
def _round_up(n, m):
    return ((n + m - 1) // m) * m


def _pick_tile_m(m, row_bytes, budget_bytes=8 * 1024 * 1024, max_tile=1024):
    """Row tile for a 1-D grid over tokens.

    Multiple of 8 (sublanes), bounded by an 8 MiB double-buffer budget (safe on
    v5e's 16 MiB scoped default and v7x's 64 MiB physical VMEM), and forced to
    give at least two grid steps when m >= 16 so "parallel" grid sharding can
    use both of v7x's TensorCores (no-op on v5e/v6e).  The caller pads M up to a
    tile multiple, so any M works (no full-array fallback).
    """
    cap = max(8, min(max_tile, (budget_bytes // max(row_bytes, 1)) // 8 * 8))
    if m >= 16:
        cap = min(cap, max(8, (m // 2) // 8 * 8))
    return min(cap, _round_up(m, 8))


def _nbytes(*arrays):
    return sum(int(a.size) * a.dtype.itemsize for a in arrays)


def _vmem_limit(nbytes):
    """Explicit scoped-VMEM limit with generous headroom, capped at 32 MiB
    (<= physical on all of v5e/v6e/v7x; raises v5e's 16 MiB default)."""
    return int(min(32 * 1024 * 1024, max(16 * 1024 * 1024, 2 * nbytes + 4 * 1024 * 1024)))


def _erf(x):
    # Abramowitz & Stegun 7.1.26 (|err| < 1.6e-7); exact divide (no approx recip).
    a1, a2, a3, a4, a5 = (0.254829592, -0.284496736, 1.421413741,
                          -1.453152027, 1.061405429)
    p = 0.3275911
    s = jnp.where(x >= 0.0, 1.0, -1.0)
    ax = jnp.abs(x)
    t = 1.0 / (1.0 + p * ax)
    poly = ((((a5 * t + a4) * t + a3) * t + a2) * t + a1) * t
    return s * (1.0 - poly * jnp.exp(-ax * ax))


def _gelu(x):
    # exact-erf GELU, matching torch.nn.GELU() default
    return 0.5 * x * (1.0 + _erf(x * 0.7071067811865476))


# ----------------------------------------------------------------------------
# Tiled Linear kernel (patch embedding and head)
# ----------------------------------------------------------------------------
def _linear_kernel(x_ref, w_ref, b_ref, o_ref):
    o_ref[...] = (jnp.dot(x_ref[...], w_ref[...], preferred_element_type=jnp.float32)
                  + b_ref[...])


def pallas_linear(x, w, b=None):
    """(M, K) @ (K, N) + b; bf16 operands, f32 accumulate/output; row-tiled grid."""
    M, K = x.shape
    N = w.shape[1]
    xb = x.astype(MATMUL_DTYPE)
    wb = w.astype(MATMUL_DTYPE)
    if b is None:
        b = jnp.zeros((N,), jnp.float32)
    b2 = b.reshape(1, N).astype(jnp.float32)

    tm = _pick_tile_m(M, row_bytes=2 * K + 4 * N)
    Mp = _round_up(M, tm)
    if Mp != M:
        xb = jnp.pad(xb, ((0, Mp - M), (0, 0)))
    per_step = tm * K * 2 + K * N * 2 + N * 4 + tm * N * 4

    out = pl.pallas_call(
        _linear_kernel,
        grid=(Mp // tm,),
        in_specs=[pl.BlockSpec((tm, K), lambda i: (i, 0)),
                  pl.BlockSpec((K, N), lambda i: (0, 0)),
                  pl.BlockSpec((1, N), lambda i: (0, 0))],
        out_specs=pl.BlockSpec((tm, N), lambda i: (i, 0)),
        out_shape=jax.ShapeDtypeStruct((Mp, N), jnp.float32),
        compiler_params=pltpu.CompilerParams(
            dimension_semantics=("parallel",),
            vmem_limit_bytes=_vmem_limit(per_step)),
    )(xb, wb, b2)
    return out[:M] if Mp != M else out


# ----------------------------------------------------------------------------
# Fused AFNO block kernel: LN1 -> DFT -> spectral mix -> iDFT -> LN2 -> MLP
# ----------------------------------------------------------------------------
def _afno_block_kernel(x_ref, g1_ref, be1_ref, dr_ref, di_ref, er_ref, ei_ref,
                       w1a_ref, w1b_ref, b1s_ref, w2s_ref, b2s_ref,
                       g2_ref, be2_ref, wm1_ref, bm1_ref, wm2_ref, bm2_ref,
                       o_ref, *, C, lam, eps):
    f32 = jnp.float32
    x = x_ref[0]                                               # (S, C) tokens, f32

    # ---- norm1 -------------------------------------------------------------
    mu = jnp.mean(x, axis=-1, keepdims=True)
    xc = x - mu
    var = jnp.mean(xc * xc, axis=-1, keepdims=True)
    xn = xc * jax.lax.rsqrt(var + eps) * g1_ref[...] + be1_ref[...]

    # ---- rfft2 (ortho) over the token axis as two small DFT matmuls ---------
    xr = jnp.dot(dr_ref[...], xn, preferred_element_type=f32)  # (Sk, C)
    xi = jnp.dot(di_ref[...], xn, preferred_element_type=f32)

    # ---- block-diagonal complex MLP collapsed to dense 2C-wide matmuls ------
    # h = [hr | hi] = xr @ [Wr | Wi] + xi @ [-Wi | Wr] + [b_r | b_i]
    h = (jnp.dot(xr, w1a_ref[...], preferred_element_type=f32)
         + jnp.dot(xi, w1b_ref[...], preferred_element_type=f32)
         + b1s_ref[...])                                        # (Sk, 2C)
    h = jnp.maximum(h, 0.0)
    o = jnp.dot(h, w2s_ref[...], preferred_element_type=f32) + b2s_ref[...]
    # softshrink (sparsity threshold), in f32 to keep torch parity near +/-lam
    o = jnp.where(o > lam, o - lam, jnp.where(o < -lam, o + lam, 0.0))

    # ---- irfft2 (ortho) as two small DFT matmuls, +bias, +first residual ----
    y = (jnp.dot(er_ref[...], o[:, :C], preferred_element_type=f32)
         + jnp.dot(ei_ref[...], o[:, C:], preferred_element_type=f32))
    x1 = y + xn + x          # AFNO2DLayer "+bias" (= xn) and Block residual (double_skip)

    # ---- norm2 + MLP (fc1 -> GELU -> fc2) + second residual -----------------
    mu2 = jnp.mean(x1, axis=-1, keepdims=True)
    x1c = x1 - mu2
    var2 = jnp.mean(x1c * x1c, axis=-1, keepdims=True)
    x2 = x1c * jax.lax.rsqrt(var2 + eps) * g2_ref[...] + be2_ref[...]
    hm = jnp.dot(x2.astype(wm1_ref.dtype), wm1_ref[...],
                 preferred_element_type=f32) + bm1_ref[...]
    hm = _gelu(hm)
    out = jnp.dot(hm.astype(wm2_ref.dtype), wm2_ref[...],
                  preferred_element_type=f32) + bm2_ref[...]
    o_ref[0] = out + x1


def _block_diag(blocks, nb, bs):
    """(nb, bs, bs) -> (nb*bs, nb*bs) block-diagonal matrix (built in the wrapper)."""
    C = nb * bs
    rows = [jnp.pad(blocks[i], ((0, 0), (i * bs, C - (i + 1) * bs))) for i in range(nb)]
    return jnp.concatenate(rows, axis=0)


def _spectral_weights(w1, b1, w2, b2):
    """Collapse the block-diagonal complex 2-layer spectral MLP into dense real
    matrices acting on the lane-dense [real | imag] feature vector."""
    nb, bs = w1.shape[1], w1.shape[2]
    w1r, w1i = _block_diag(w1[0], nb, bs), _block_diag(w1[1], nb, bs)   # (C, C)
    w2r, w2i = _block_diag(w2[0], nb, bs), _block_diag(w2[1], nb, bs)
    w1a = jnp.concatenate([w1r, w1i], axis=1)                           # (C, 2C), xr path
    w1b = jnp.concatenate([-w1i, w1r], axis=1)                          # (C, 2C), xi path
    w2big = jnp.concatenate(
        [jnp.concatenate([w2r, w2i], axis=1),
         jnp.concatenate([-w2i, w2r], axis=1)], axis=0)                 # (2C, 2C)
    b1big = jnp.concatenate([b1[0].reshape(-1), b1[1].reshape(-1)])     # (2C,)
    b2big = jnp.concatenate([b2[0].reshape(-1), b2[1].reshape(-1)])
    return (w1a.astype(jnp.float32), w1b.astype(jnp.float32), b1big.astype(jnp.float32),
            w2big.astype(jnp.float32), b2big.astype(jnp.float32))


def _dft_mats(h, w, frac):
    """rfft2 / irfft2 (norm="ortho") over the (h, w) token grid as real matmul
    operators, restricted to the hard-thresholding window.  Built with numpy at
    trace time from impulses, so the semantics (incl. DC/Nyquist imag handling of
    irfft) exactly match the library FFTs."""
    Wf = w // 2 + 1
    S, Sf = h * w, h * Wf
    total_modes = h // 2 + 1
    kept = int(total_modes * frac)
    h_lo = max(total_modes - kept, 0)
    h_hi = min(total_modes + kept, h)
    kept_w = min(kept, Wf)
    # TODO(synk): window replicates the reference slicing; verify for
    # hard_thresholding_fraction < 1 on non-square token grids.
    kept_idx = np.array([hi * Wf + wi for hi in range(h_lo, h_hi)
                         for wi in range(kept_w)], dtype=np.int64)
    Sk = int(kept_idx.size)
    Skp = max(8, _round_up(max(Sk, 1), 8))   # sublane pad; zero rows/cols are inert

    imp = np.eye(S, dtype=np.float64).reshape(S, h, w)
    F = np.fft.rfft2(imp, axes=(1, 2), norm="ortho").reshape(S, Sf).T    # (Sf, S)
    dr = np.zeros((Skp, S)); di = np.zeros((Skp, S))
    if Sk:
        dr[:Sk] = F.real[kept_idx]
        di[:Sk] = F.imag[kept_idx]

    simp = np.eye(Sf, dtype=np.float64).reshape(Sf, h, Wf)
    er_full = np.fft.irfft2(simp.astype(np.complex128), s=(h, w), axes=(1, 2),
                            norm="ortho").reshape(Sf, S).T               # (S, Sf)
    ei_full = np.fft.irfft2(1j * simp, s=(h, w), axes=(1, 2),
                            norm="ortho").reshape(Sf, S).T
    er = np.zeros((S, Skp)); ei = np.zeros((S, Skp))
    if Sk:
        er[:, :Sk] = er_full[:, kept_idx]
        ei[:, :Sk] = ei_full[:, kept_idx]

    return (jnp.asarray(dr, jnp.float32), jnp.asarray(di, jnp.float32),
            jnp.asarray(er, jnp.float32), jnp.asarray(ei, jnp.float32))


def pallas_afno_block(tokens, blk, dmats, lam, eps=LN_EPS):
    """One full AFNO Block (double_skip=True) as a single pallas_call, grid over batch."""
    B, S, C = tokens.shape
    dr, di, er, ei = dmats
    Hd = blk["fc1_w"].shape[0]

    w1a, w1b, b1s, w2s, b2s = _spectral_weights(blk["w1"], blk["b1"],
                                                blk["w2"], blk["b2"])
    wm1 = blk["fc1_w"].T.astype(MATMUL_DTYPE)          # (C, Hd)
    wm2 = blk["fc2_w"].T.astype(MATMUL_DTYPE)          # (Hd, C)

    args = (tokens.astype(jnp.float32),
            blk["norm1_w"].reshape(1, C).astype(jnp.float32),
            blk["norm1_b"].reshape(1, C).astype(jnp.float32),
            dr, di, er, ei,
            w1a, w1b, b1s.reshape(1, 2 * C), w2s, b2s.reshape(1, 2 * C),
            blk["norm2_w"].reshape(1, C).astype(jnp.float32),
            blk["norm2_b"].reshape(1, C).astype(jnp.float32),
            wm1, blk["fc1_b"].reshape(1, Hd).astype(jnp.float32),
            wm2, blk["fc2_b"].reshape(1, C).astype(jnp.float32))

    def rep(a):  # resident operand: full-array block, same tile every grid step
        n = a.ndim
        return pl.BlockSpec(a.shape, lambda b, n=n: (0,) * n)

    in_specs = ([pl.BlockSpec((1, S, C), lambda b: (b, 0, 0))]
                + [rep(a) for a in args[1:]])

    return pl.pallas_call(
        functools.partial(_afno_block_kernel, C=C, lam=float(lam), eps=float(eps)),
        grid=(B,),
        in_specs=in_specs,
        out_specs=pl.BlockSpec((1, S, C), lambda b: (b, 0, 0)),
        out_shape=jax.ShapeDtypeStruct((B, S, C), jnp.float32),
        compiler_params=pltpu.CompilerParams(
            dimension_semantics=("parallel",),      # batch steps shard across v7x TCs
            vmem_limit_bytes=_vmem_limit(_nbytes(*args) + S * C * 4)),
    )(*args)


# ----------------------------------------------------------------------------
# Model glue (reshapes only) in plain JAX
# ----------------------------------------------------------------------------
def patch_embed(x, proj_w, proj_b, patch_size):
    """PatchEmbed with pad_size=None: stride==kernel Conv2d as one tiled matmul."""
    B, Cin, H, W = x.shape
    ph, pw = patch_size
    h, w = H // ph, W // pw
    xp = x.reshape(B, Cin, h, ph, w, pw)
    xp = jnp.transpose(xp, (0, 2, 4, 1, 3, 5)).reshape(B * h * w, Cin * ph * pw)
    wf = proj_w.reshape(proj_w.shape[0], -1).T             # (Cin*ph*pw, E)
    y = pallas_linear(xp, wf, proj_b)                       # (B*h*w, E), f32
    return y.reshape(B, h * w, -1)


def solar_radiation_net_forward(x, params, cfg):
    """Forward pass of SolarRadiationNet (dim=2, pad_size=None)."""
    B, Cin, H, W = x.shape
    ph, pw = cfg["patch_size"]
    C = cfg["embed_dim"]
    out_ch = cfg["out_channels"]
    h, w = H // ph, W // pw

    tokens = patch_embed(x, params["proj_w"], params["proj_b"], (ph, pw))   # (B, S, C)
    dmats = _dft_mats(h, w, cfg["hard_thresholding_fraction"])
    for blk in params["blocks"]:
        tokens = pallas_afno_block(tokens, blk, dmats, cfg["sparsity_threshold"])

    # head (Linear, no bias).  Pad N to a 128-lane multiple for dense stores.
    head_w = params["head_w"].T                             # (C, out_ch*ph*pw)
    N = head_w.shape[1]
    Np = _round_up(N, 128)
    if Np != N:
        head_w = jnp.pad(head_w, ((0, 0), (0, Np - N)))
    y = pallas_linear(tokens.reshape(B * h * w, C), head_w)[:, :N]

    # un-patchify back to (B, out_ch, H, W)
    y = y.reshape(B, h, w, ph, pw, out_ch)
    y = jnp.transpose(y, (0, 5, 1, 3, 2, 4))                # (B, out, h, ph, w, pw)
    return y.reshape(B, out_ch, h * ph, w * pw)


# ----------------------------------------------------------------------------
# Deterministic synthetic parameter initialization
# ----------------------------------------------------------------------------
def init_params(key, cfg):
    C = cfg["embed_dim"]
    Cin = cfg["in_channels"]
    ph, pw = cfg["patch_size"]
    nb = cfg["num_blocks"]
    bs = C // nb
    hidden = int(C * cfg["mlp_ratio"])
    out_ch = cfg["out_channels"]
    depth = cfg["depth"]

    def tn(k, shape):
        return 0.02 * jax.random.truncated_normal(k, -2.0, 2.0, shape, jnp.float32)

    keys = iter(jax.random.split(key, 2 + 6 * depth))
    params = {
        "proj_w": 0.02 * jax.random.normal(next(keys), (C, Cin, ph, pw), jnp.float32),
        "proj_b": jnp.zeros((C,), jnp.float32),
        "blocks": [],
    }
    for _ in range(depth):
        params["blocks"].append({
            "norm1_w": jnp.ones((C,), jnp.float32),
            "norm1_b": jnp.zeros((C,), jnp.float32),
            "w1": 0.02 * jax.random.normal(next(keys), (2, nb, bs, bs), jnp.float32),
            "b1": 0.02 * jax.random.normal(next(keys), (2, nb, bs), jnp.float32),
            "w2": 0.02 * jax.random.normal(next(keys), (2, nb, bs, bs), jnp.float32),
            "b2": 0.02 * jax.random.normal(next(keys), (2, nb, bs), jnp.float32),
            "norm2_w": jnp.ones((C,), jnp.float32),
            "norm2_b": jnp.zeros((C,), jnp.float32),
            "fc1_w": tn(next(keys), (hidden, C)),   # torch layout (out, in)
            "fc1_b": jnp.zeros((hidden,), jnp.float32),
            "fc2_w": tn(next(keys), (C, hidden)),
            "fc2_b": jnp.zeros((C,), jnp.float32),
        })
    params["head_w"] = tn(next(keys), (out_ch * ph * pw, C))   # torch layout (out, in)
    return params


# ----------------------------------------------------------------------------
if __name__ == "__main__":
    cfg = dict(
        dim=2,
        in_channels=2,
        out_channels=1,
        patch_size=[8, 8],
        pad_size=None,
        embed_dim=128,
        depth=2,
        mlp_ratio=4.0,
        num_blocks=4,
        sparsity_threshold=0.01,
        hard_thresholding_fraction=1.0,
    )

    key = jax.random.PRNGKey(0)
    k_x, k_p = jax.random.split(key)
    B, H, W = 2, 32, 32
    x = jax.random.normal(k_x, (B, cfg["in_channels"], H, W), jnp.float32)  # NCHW

    params = init_params(k_p, cfg)
    fwd = jax.jit(lambda xx, pp: solar_radiation_net_forward(xx, pp, cfg))
    out = jax.block_until_ready(fwd(x, params))

    assert out.shape == (B, cfg["out_channels"], H, W), out.shape
    assert out.dtype == jnp.float32
    assert bool(jnp.all(jnp.isfinite(out)))
    print("KERNEL_OK")
</pallas_src>

<mosaic_0001>
module attributes {stable_mosaic.version = 11 : i64} {
  func.func @_linear_kernel(%arg0: i32, %arg1: memref<16x128xbf16, #tpu.memory_space<vmem>>, %arg2: memref<128x128xbf16, #tpu.memory_space<vmem>>, %arg3: memref<1x128xf32, #tpu.memory_space<vmem>>, %arg4: memref<16x128xf32, #tpu.memory_space<vmem>>) attributes {dimension_semantics = [#tpu.dimension_semantics<parallel>], iteration_bounds = array<i64: 2>, scalar_prefetch = 0 : i64, scratch_operands = 0 : i64, tpu.core_type = #tpu.core_type<tc>, window_params = [{transform_indices = @transform_0, window_bounds = array<i64: 16, 128>}, {pipeline_mode = #tpu.pipeline_mode<synchronous>, transform_indices = @transform_1, window_bounds = array<i64: 128, 128>}, {pipeline_mode = #tpu.pipeline_mode<synchronous>, transform_indices = @transform_2, window_bounds = array<i64: 1, 128>}, {transform_indices = @transform_3, window_bounds = array<i64: 16, 128>}]} {
    %c0 = arith.constant 0 : index
    %c0_0 = arith.constant 0 : index
    %0 = vector.load %arg1[%c0, %c0_0] : memref<16x128xbf16, #tpu.memory_space<vmem>>, vector<16x128xbf16>
    %c0_1 = arith.constant 0 : index
    %c0_2 = arith.constant 0 : index
    %1 = vector.load %arg2[%c0_1, %c0_2] : memref<128x128xbf16, #tpu.memory_space<vmem>>, vector<128x128xbf16>
    %cst = arith.constant dense<0.000000e+00> : vector<16x128xf32>
    %2 = tpu.matmul %0, %1, %cst {dimension_numbers = #tpu.dot_dimension_numbers<[1], [0], [0], [1], [0, 0, 1, 1], [], []>} : vector<16x128xbf16>, vector<128x128xbf16>, vector<16x128xf32> -> vector<16x128xf32>
    %c0_3 = arith.constant 0 : index
    %c0_4 = arith.constant 0 : index
    %3 = vector.load %arg3[%c0_3, %c0_4] : memref<1x128xf32, #tpu.memory_space<vmem>>, vector<1x128xf32>
    %4 = vector.broadcast %3 : vector<1x128xf32> to vector<16x128xf32>
    %5 = arith.addf %2, %4 : vector<16x128xf32>
    %c0_5 = arith.constant 0 : index
    %c0_6 = arith.constant 0 : index
    %6 = vector.load %arg4[%c0_5, %c0_6] : memref<16x128xf32, #tpu.memory_space<vmem>>, vector<16x128xf32>
    tpu.vector_store %arg4[%c0_5, %c0_6], %5 {strides = array<i32>} : memref<16x128xf32, #tpu.memory_space<vmem>>, vector<16x128xf32>,
    return
  }
  func.func @transform_0(%arg0: i32) -> (i32, i32) {
    %c0_i32 = arith.constant 0 : i32
    %c0_i32_0 = arith.constant 0 : i32
    return %arg0, %c0_i32 : i32, i32
  }
  func.func @transform_1(%arg0: i32) -> (i32, i32) {
    %c0_i32 = arith.constant 0 : i32
    %c0_i32_0 = arith.constant 0 : i32
    %c0_i32_1 = arith.constant 0 : i32
    return %c0_i32, %c0_i32_0 : i32, i32
  }
  func.func @transform_2(%arg0: i32) -> (i32, i32) {
    %c0_i32 = arith.constant 0 : i32
    %c0_i32_0 = arith.constant 0 : i32
    %c0_i32_1 = arith.constant 0 : i32
    return %c0_i32, %c0_i32_0 : i32, i32
  }
  func.func @transform_3(%arg0: i32) -> (i32, i32) {
    %c0_i32 = arith.constant 0 : i32
    %c0_i32_0 = arith.constant 0 : i32
    return %arg0, %c0_i32 : i32, i32
  }
}

module attributes {stable_mosaic.version = 11 : i64} {
  func.func @_afno_block_kernel(%arg0: i32, %arg1: memref<1x16x128xf32, #tpu.memory_space<vmem>>, %arg2: memref<1x128xf32, #tpu.memory_space<vmem>>, %arg3: memref<1x128xf32, #tpu.memory_space<vmem>>, %arg4: memref<16x16xf32, #tpu.memory_space<vmem>>, %arg5: memref<16x16xf32, #tpu.memory_space<vmem>>, %arg6: memref<16x16xf32, #tpu.memory_space<vmem>>, %arg7: memref<16x16xf32, #tpu.memory_space<vmem>>, %arg8: memref<128x256xf32, #tpu.memory_space<vmem>>, %arg9: memref<128x256xf32, #tpu.memory_space<vmem>>, %arg10: memref<1x256xf32, #tpu.memory_space<vmem>>, %arg11: memref<256x256xf32, #tpu.memory_space<vmem>>, %arg12: memref<1x256xf32, #tpu.memory_space<vmem>>, %arg13: memref<1x128xf32, #tpu.memory_space<vmem>>, %arg14: memref<1x128xf32, #tpu.memory_space<vmem>>, %arg15: memref<128x512xbf16, #tpu.memory_space<vmem>>, %arg16: memref<1x512xf32, #tpu.memory_space<vmem>>, %arg17: memref<512x128xbf16, #tpu.memory_space<vmem>>, %arg18: memref<1x128xf32, #tpu.memory_space<vmem>>, %arg19: memref<1x16x128xf32, #tpu.memory_space<vmem>>) attributes {dimension_semantics = [#tpu.dimension_semantics<parallel>], iteration_bounds = array<i64: 2>, scalar_prefetch = 0 : i64, scratch_operands = 0 : i64, tpu.core_type = #tpu.core_type<tc>, window_params = [{transform_indices = @transform_0, window_bounds = array<i64: 1, 16, 128>}, {pipeline_mode = #tpu.pipeline_mode<synchronous>, transform_indices = @transform_1, window_bounds = array<i64: 1, 128>}, {pipeline_mode = #tpu.pipeline_mode<synchronous>, transform_indices = @transform_2, window_bounds = array<i64: 1, 128>}, {pipeline_mode = #tpu.pipeline_mode<synchronous>, transform_indices = @transform_3, window_bounds = array<i64: 16, 16>}, {pipeline_mode = #tpu.pipeline_mode<synchronous>, transform_indices = @transform_4, window_bounds = array<i64: 16, 16>}, {pipeline_mode = #tpu.pipeline_mode<synchronous>, transform_indices = @transform_5, window_bounds = array<i64: 16, 16>}, {pipeline_mode = #tpu.pipeline_mode<synchronous>, transform_indices = @transform_6, window_bounds = array<i64: 16, 16>}, {pipeline_mode = #tpu.pipeline_mode<synchronous>, transform_indices = @transform_7, window_bounds = array<i64: 128, 256>}, {pipeline_mode = #tpu.pipeline_mode<synchronous>, transform_indices = @transform_8, window_bounds = array<i64: 128, 256>}, {pipeline_mode = #tpu.pipeline_mode<synchronous>, transform_indices = @transform_9, window_bounds = array<i64: 1, 256>}, {pipeline_mode = #tpu.pipeline_mode<synchronous>, transform_indices = @transform_10, window_bounds = array<i64: 256, 256>}, {pipeline_mode = #tpu.pipeline_mode<synchronous>, transform_indices = @transform_11, window_bounds = array<i64: 1, 256>}, {pipeline_mode = #tpu.pipeline_mode<synchronous>, transform_indices = @transform_12, window_bounds = array<i64: 1, 128>}, {pipeline_mode = #tpu.pipeline_mode<synchronous>, transform_indices = @transform_13, window_bounds = array<i64: 1, 128>}, {pipeline_mode = #tpu.pipeline_mode<synchronous>, transform_indices = @transform_14, window_bounds = array<i64: 128, 512>}, {pipeline_mode = #tpu.pipeline_mode<synchronous>, transform_indices = @transform_15, window_bounds = array<i64: 1, 512>}, {pipeline_mode = #tpu.pipeline_mode<synchronous>, transform_indices = @transform_16, window_bounds = array<i64: 512, 128>}, {pipeline_mode = #tpu.pipeline_mode<synchronous>, transform_indices = @transform_17, window_bounds = array<i64: 1, 128>}, {transform_indices = @transform_18, window_bounds = array<i64: 1, 16, 128>}]} {
    %c0 = arith.constant 0 : index
    %c0_0 = arith.constant 0 : index
    %c0_1 = arith.constant 0 : index
    %0 = vector.load %arg1[%c0, %c0_0, %c0_1] : memref<1x16x128xf32, #tpu.memory_space<vmem>>, vector<1x16x128xf32>
    %1 = vector.shape_cast %0 : vector<1x16x128xf32> to vector<16x128xf32>
    %cst = arith.constant dense<0.000000e+00> : vector<16xf32>
    %2 = vector.multi_reduction <add>, %1, %cst [1] : vector<16x128xf32> to vector<16xf32>
    %3 = vector.shape_cast %2 : vector<16xf32> to vector<16x1xf32>
    %cst_2 = arith.constant 1.280000e+02 : f32
    %4 = vector.broadcast %cst_2 : f32 to vector<16x1xf32>
    %5 = arith.divf %3, %4 : vector<16x1xf32>
    %6 = vector.broadcast %5 : vector<16x1xf32> to vector<16x128xf32>
    %7 = arith.subf %1, %6 : vector<16x128xf32>
    %8 = arith.mulf %7, %7 : vector<16x128xf32>
    %cst_3 = arith.constant dense<0.000000e+00> : vector<16xf32>
    %9 = vector.multi_reduction <add>, %8, %cst_3 [1] : vector<16x128xf32> to vector<16xf32>
    %10 = vector.shape_cast %9 : vector<16xf32> to vector<16x1xf32>
    %cst_4 = arith.constant 1.280000e+02 : f32
    %11 = vector.broadcast %cst_4 : f32 to vector<16x1xf32>
    %12 = arith.divf %10, %11 : vector<16x1xf32>
    %cst_5 = arith.constant 9.99999997E-7 : f32
    %13 = vector.broadcast %cst_5 : f32 to vector<16x1xf32>
    %14 = arith.addf %12, %13 : vector<16x1xf32>
    %15 = math.rsqrt %14 : vector<16x1xf32>
    %16 = vector.broadcast %15 : vector<16x1xf32> to vector<16x128xf32>
    %17 = arith.mulf %7, %16 : vector<16x128xf32>
    %c0_6 = arith.constant 0 : index
    %c0_7 = arith.constant 0 : index
    %18 = vector.load %arg2[%c0_6, %c0_7] : memref<1x128xf32, #tpu.memory_space<vmem>>, vector<1x128xf32>
    %19 = vector.broadcast %18 : vector<1x128xf32> to vector<16x128xf32>
    %20 = arith.mulf %17, %19 : vector<16x128xf32>
    %c0_8 = arith.constant 0 : index
    %c0_9 = arith.constant 0 : index
    %21 = vector.load %arg3[%c0_8, %c0_9] : memref<1x128xf32, #tpu.memory_space<vmem>>, vector<1x128xf32>
    %22 = vector.broadcast %21 : vector<1x128xf32> to vector<16x128xf32>
    %23 = arith.addf %20, %22 : vector<16x128xf32>
    %c0_10 = arith.constant 0 : index
    %c0_11 = arith.constant 0 : index
    %24 = vector.load %arg4[%c0_10, %c0_11] : memref<16x16xf32, #tpu.memory_space<vmem>>, vector<16x16xf32>
    %cst_12 = arith.constant dense<0.000000e+00> : vector<16x128xf32>
    %25 = tpu.matmul %24, %23, %cst_12 {dimension_numbers = #tpu.dot_dimension_numbers<[1], [0], [0], [1], [0, 0, 1, 1], [], []>} : vector<16x16xf32>, vector<16x128xf32>, vector<16x128xf32> -> vector<16x128xf32>
    %c0_13 = arith.constant 0 : index
    %c0_14 = arith.constant 0 : index
    %26 = vector.load %arg5[%c0_13, %c0_14] : memref<16x16xf32, #tpu.memory_space<vmem>>, vector<16x16xf32>
    %cst_15 = arith.constant dense<0.000000e+00> : vector<16x128xf32>
    %27 = tpu.matmul %26, %23, %cst_15 {dimension_numbers = #tpu.dot_dimension_numbers<[1], [0], [0], [1], [0, 0, 1, 1], [], []>} : vector<16x16xf32>, vector<16x128xf32>, vector<16x128xf32> -> vector<16x128xf32>
    %c0_16 = arith.constant 0 : index
    %c0_17 = arith.constant 0 : index
    %28 = vector.load %arg8[%c0_16, %c0_17] : memref<128x256xf32, #tpu.memory_space<vmem>>, vector<128x256xf32>
    %cst_18 = arith.constant dense<0.000000e+00> : vector<16x256xf32>
    %29 = tpu.matmul %25, %28, %cst_18 {dimension_numbers = #tpu.dot_dimension_numbers<[1], [0], [0], [1], [0, 0, 1, 1], [], []>} : vector<16x128xf32>, vector<128x256xf32>, vector<16x256xf32> -> vector<16x256xf32>
    %c0_19 = arith.constant 0 : index
    %c0_20 = arith.constant 0 : index
    %30 = vector.load %arg9[%c0_19, %c0_20] : memref<128x256xf32, #tpu.memory_space<vmem>>, vector<128x256xf32>
    %cst_21 = arith.constant dense<0.000000e+00> : vector<16x256xf32>
    %31 = tpu.matmul %27, %30, %cst_21 {dimension_numbers = #tpu.dot_dimension_numbers<[1], [0], [0], [1], [0, 0, 1, 1], [], []>} : vector<16x128xf32>, vector<128x256xf32>, vector<16x256xf32> -> vector<16x256xf32>
    %32 = arith.addf %29, %31 : vector<16x256xf32>
    %c0_22 = arith.constant 0 : index
    %c0_23 = arith.constant 0 : index
    %33 = vector.load %arg10[%c0_22, %c0_23] : memref<1x256xf32, #tpu.memory_space<vmem>>, vector<1x256xf32>
    %34 = vector.broadcast %33 : vector<1x256xf32> to vector<16x256xf32>
    %35 = arith.addf %32, %34 : vector<16x256xf32>
    %cst_24 = arith.constant 0.000000e+00 : f32
    %36 = vector.broadcast %cst_24 : f32 to vector<16x256xf32>
    %37 = arith.maximumf %35, %36 : vector<16x256xf32>
    %c0_25 = arith.constant 0 : index
    %c0_26 = arith.constant 0 : index
    %38 = vector.load %arg11[%c0_25, %c0_26] : memref<256x256xf32, #tpu.memory_space<vmem>>, vector<256x256xf32>
    %cst_27 = arith.constant dense<0.000000e+00> : vector<16x256xf32>
    %39 = tpu.matmul %37, %38, %cst_27 {dimension_numbers = #tpu.dot_dimension_numbers<[1], [0], [0], [1], [0, 0, 1, 1], [], []>} : vector<16x256xf32>, vector<256x256xf32>, vector<16x256xf32> -> vector<16x256xf32>
    %c0_28 = arith.constant 0 : index
    %c0_29 = arith.constant 0 : index
    %40 = vector.load %arg12[%c0_28, %c0_29] : memref<1x256xf32, #tpu.memory_space<vmem>>, vector<1x256xf32>
    %41 = vector.broadcast %40 : vector<1x256xf32> to vector<16x256xf32>
    %42 = arith.addf %39, %41 : vector<16x256xf32>
    %cst_30 = arith.constant 0.00999999977 : f32
    %43 = vector.broadcast %cst_30 : f32 to vector<16x256xf32>
    %44 = arith.cmpf ogt, %42, %43 : vector<16x256xf32>
    %cst_31 = arith.constant 0.00999999977 : f32
    %45 = vector.broadcast %cst_31 : f32 to vector<16x256xf32>
    %46 = arith.subf %42, %45 : vector<16x256xf32>
    %cst_32 = arith.constant -0.00999999977 : f32
    %47 = vector.broadcast %cst_32 : f32 to vector<16x256xf32>
    %48 = arith.cmpf olt, %42, %47 : vector<16x256xf32>
    %cst_33 = arith.constant 0.00999999977 : f32
    %49 = vector.broadcast %cst_33 : f32 to vector<16x256xf32>
    %50 = arith.addf %42, %49 : vector<16x256xf32>
    %cst_34 = arith.constant 0.000000e+00 : f32
    %51 = vector.broadcast %cst_34 : f32 to vector<16x256xf32>
    %52 = arith.select %48, %50, %51 : vector<16x256xi1>, vector<16x256xf32>
    %53 = arith.select %44, %46, %52 : vector<16x256xi1>, vector<16x256xf32>
    %c0_35 = arith.constant 0 : index
    %c0_36 = arith.constant 0 : index
    %54 = vector.load %arg6[%c0_35, %c0_36] : memref<16x16xf32, #tpu.memory_space<vmem>>, vector<16x16xf32>
    %55 = vector.extract_strided_slice %53 {offsets = [0, 0], sizes = [16, 128], strides = [1, 1]} : vector<16x256xf32> to vector<16x128xf32>
    %cst_37 = arith.constant dense<0.000000e+00> : vector<16x128xf32>
    %56 = tpu.matmul %54, %55, %cst_37 {dimension_numbers = #tpu.dot_dimension_numbers<[1], [0], [0], [1], [0, 0, 1, 1], [], []>} : vector<16x16xf32>, vector<16x128xf32>, vector<16x128xf32> -> vector<16x128xf32>
    %c0_38 = arith.constant 0 : index
    %c0_39 = arith.constant 0 : index
    %57 = vector.load %arg7[%c0_38, %c0_39] : memref<16x16xf32, #tpu.memory_space<vmem>>, vector<16x16xf32>
    %58 = vector.extract_strided_slice %53 {offsets = [0, 128], sizes = [16, 128], strides = [1, 1]} : vector<16x256xf32> to vector<16x128xf32>
    %cst_40 = arith.constant dense<0.000000e+00> : vector<16x128xf32>
    %59 = tpu.matmul %57, %58, %cst_40 {dimension_numbers = #tpu.dot_dimension_numbers<[1], [0], [0], [1], [0, 0, 1, 1], [], []>} : vector<16x16xf32>, vector<16x128xf32>, vector<16x128xf32> -> vector<16x128xf32>
    %60 = arith.addf %56, %59 : vector<16x128xf32>
    %61 = arith.addf %60, %23 : vector<16x128xf32>
    %62 = arith.addf %61, %1 : vector<16x128xf32>
    %cst_41 = arith.constant dense<0.000000e+00> : vector<16xf32>
    %63 = vector.multi_reduction <add>, %62, %cst_41 [1] : vector<16x128xf32> to vector<16xf32>
    %64 = vector.shape_cast %63 : vector<16xf32> to vector<16x1xf32>
    %cst_42 = arith.constant 1.280000e+02 : f32
    %65 = vector.broadcast %cst_42 : f32 to vector<16x1xf32>
    %66 = arith.divf %64, %65 : vector<16x1xf32>
    %67 = vector.broadcast %66 : vector<16x1xf32> to vector<16x128xf32>
    %68 = arith.subf %62, %67 : vector<16x128xf32>
    %69 = arith.mulf %68, %68 : vector<16x128xf32>
    %cst_43 = arith.constant dense<0.000000e+00> : vector<16xf32>
    %70 = vector.multi_reduction <add>, %69, %cst_43 [1] : vector<16x128xf32> to vector<16xf32>
    %71 = vector.shape_cast %70 : vector<16xf32> to vector<16x1xf32>
    %cst_44 = arith.constant 1.280000e+02 : f32
    %72 = vector.broadcast %cst_44 : f32 to vector<16x1xf32>
    %73 = arith.divf %71, %72 : vector<16x1xf32>
    %cst_45 = arith.constant 9.99999997E-7 : f32
    %74 = vector.broadcast %cst_45 : f32 to vector<16x1xf32>
    %75 = arith.addf %73, %74 : vector<16x1xf32>
    %76 = math.rsqrt %75 : vector<16x1xf32>
    %77 = vector.broadcast %76 : vector<16x1xf32> to vector<16x128xf32>
    %78 = arith.mulf %68, %77 : vector<16x128xf32>
    %c0_46 = arith.constant 0 : index
    %c0_47 = arith.constant 0 : index
    %79 = vector.load %arg13[%c0_46, %c0_47] : memref<1x128xf32, #tpu.memory_space<vmem>>, vector<1x128xf32>
    %80 = vector.broadcast %79 : vector<1x128xf32> to vector<16x128xf32>
    %81 = arith.mulf %78, %80 : vector<16x128xf32>
    %c0_48 = arith.constant 0 : index
    %c0_49 = arith.constant 0 : index
    %82 = vector.load %arg14[%c0_48, %c0_49] : memref<1x128xf32, #tpu.memory_space<vmem>>, vector<1x128xf32>
    %83 = vector.broadcast %82 : vector<1x128xf32> to vector<16x128xf32>
    %84 = arith.addf %81, %83 : vector<16x128xf32>
    %85 = arith.truncf %84 : vector<16x128xf32> to vector<16x128xbf16>
    %c0_50 = arith.constant 0 : index
    %c0_51 = arith.constant 0 : index
    %86 = vector.load %arg15[%c0_50, %c0_51] : memref<128x512xbf16, #tpu.memory_space<vmem>>, vector<128x512xbf16>
    %cst_52 = arith.constant dense<0.000000e+00> : vector<16x512xf32>
    %87 = tpu.matmul %85, %86, %cst_52 {dimension_numbers = #tpu.dot_dimension_numbers<[1], [0], [0], [1], [0, 0, 1, 1], [], []>} : vector<16x128xbf16>, vector<128x512xbf16>, vector<16x512xf32> -> vector<16x512xf32>
    %c0_53 = arith.constant 0 : index
    %c0_54 = arith.constant 0 : index
    %88 = vector.load %arg16[%c0_53, %c0_54] : memref<1x512xf32, #tpu.memory_space<vmem>>, vector<1x512xf32>
    %89 = vector.broadcast %88 : vector<1x512xf32> to vector<16x512xf32>
    %90 = arith.addf %87, %89 : vector<16x512xf32>
    %cst_55 = arith.constant 5.000000e-01 : f32
    %91 = vector.broadcast %cst_55 : f32 to vector<16x512xf32>
    %92 = arith.mulf %91, %90 : vector<16x512xf32>
    %cst_56 = arith.constant 0.707106769 : f32
    %93 = vector.broadcast %cst_56 : f32 to vector<16x512xf32>
    %94 = arith.mulf %90, %93 : vector<16x512xf32>
    %cst_57 = arith.constant 0.000000e+00 : f32
    %95 = vector.broadcast %cst_57 : f32 to vector<16x512xf32>
    %96 = arith.cmpf oge, %94, %95 : vector<16x512xf32>
    %cst_58 = arith.constant 1.000000e+00 : f32
    %cst_59 = arith.constant -1.000000e+00 : f32
    %97 = vector.broadcast %cst_58 : f32 to vector<16x512xf32>
    %98 = vector.broadcast %cst_59 : f32 to vector<16x512xf32>
    %99 = arith.select %96, %97, %98 : vector<16x512xi1>, vector<16x512xf32>
    %100 = math.absf %94 : vector<16x512xf32>
    %cst_60 = arith.constant 0.327591091 : f32
    %101 = vector.broadcast %cst_60 : f32 to vector<16x512xf32>
    %102 = arith.mulf %101, %100 : vector<16x512xf32>
    %cst_61 = arith.constant 1.000000e+00 : f32
    %103 = vector.broadcast %cst_61 : f32 to vector<16x512xf32>
    %104 = arith.addf %103, %102 : vector<16x512xf32>
    %cst_62 = arith.constant 1.000000e+00 : f32
    %105 = vector.broadcast %cst_62 : f32 to vector<16x512xf32>
    %106 = arith.divf %105, %104 : vector<16x512xf32>
    %cst_63 = arith.constant 1.06140542 : f32
    %107 = vector.broadcast %cst_63 : f32 to vector<16x512xf32>
    %108 = arith.mulf %107, %106 : vector<16x512xf32>
    %cst_64 = arith.constant -1.45315206 : f32
    %109 = vector.broadcast %cst_64 : f32 to vector<16x512xf32>
    %110 = arith.addf %108, %109 : vector<16x512xf32>
    %111 = arith.mulf %110, %106 : vector<16x512xf32>
    %cst_65 = arith.constant 1.42141378 : f32
    %112 = vector.broadcast %cst_65 : f32 to vector<16x512xf32>
    %113 = arith.addf %111, %112 : vector<16x512xf32>
    %114 = arith.mulf %113, %106 : vector<16x512xf32>
    %cst_66 = arith.constant -0.284496725 : f32
    %115 = vector.broadcast %cst_66 : f32 to vector<16x512xf32>
    %116 = arith.addf %114, %115 : vector<16x512xf32>
    %117 = arith.mulf %116, %106 : vector<16x512xf32>
    %cst_67 = arith.constant 0.254829586 : f32
    %118 = vector.broadcast %cst_67 : f32 to vector<16x512xf32>
    %119 = arith.addf %117, %118 : vector<16x512xf32>
    %120 = arith.mulf %119, %106 : vector<16x512xf32>
    %cst_68 = arith.constant 0.000000e+00 : f32
    %121 = vector.broadcast %cst_68 : f32 to vector<16x512xf32>
    %122 = arith.subf %121, %100 : vector<16x512xf32>
    %123 = arith.mulf %122, %100 : vector<16x512xf32>
    %124 = math.exp %123 : vector<16x512xf32>
    %125 = arith.mulf %120, %124 : vector<16x512xf32>
    %cst_69 = arith.constant 1.000000e+00 : f32
    %126 = vector.broadcast %cst_69 : f32 to vector<16x512xf32>
    %127 = arith.subf %126, %125 : vector<16x512xf32>
    %128 = arith.mulf %99, %127 : vector<16x512xf32>
    %cst_70 = arith.constant 1.000000e+00 : f32
    %129 = vector.broadcast %cst_70 : f32 to vector<16x512xf32>
    %130 = arith.addf %129, %128 : vector<16x512xf32>
    %131 = arith.mulf %92, %130 : vector<16x512xf32>
    %132 = arith.truncf %131 : vector<16x512xf32> to vector<16x512xbf16>
    %c0_71 = arith.constant 0 : index
    %c0_72 = arith.constant 0 : index
    %133 = vector.load %arg17[%c0_71, %c0_72] : memref<512x128xbf16, #tpu.memory_space<vmem>>, vector<512x128xbf16>
    %cst_73 = arith.constant dense<0.000000e+00> : vector<16x128xf32>
    %134 = tpu.matmul %132, %133, %cst_73 {dimension_numbers = #tpu.dot_dimension_numbers<[1], [0], [0], [1], [0, 0, 1, 1], [], []>} : vector<16x512xbf16>, vector<512x128xbf16>, vector<16x128xf32> -> vector<16x128xf32>
    %c0_74 = arith.constant 0 : index
    %c0_75 = arith.constant 0 : index
    %135 = vector.load %arg18[%c0_74, %c0_75] : memref<1x128xf32, #tpu.memory_space<vmem>>, vector<1x128xf32>
    %136 = vector.broadcast %135 : vector<1x128xf32> to vector<16x128xf32>
    %137 = arith.addf %134, %136 : vector<16x128xf32>
    %138 = arith.addf %137, %62 : vector<16x128xf32>
    %c0_76 = arith.constant 0 : index
    %c0_77 = arith.constant 0 : index
    %c0_78 = arith.constant 0 : index
    %139 = vector.load %arg19[%c0_76, %c0_77, %c0_78] : memref<1x16x128xf32, #tpu.memory_space<vmem>>, vector<1x16x128xf32>
    %140 = vector.shape_cast %139 : vector<1x16x128xf32> to vector<16x128xf32>
    %141 = vector.shape_cast %138 : vector<16x128xf32> to vector<1x16x128xf32>
    tpu.vector_store %arg19[%c0_76, %c0_77, %c0_78], %141 {strides = array<i32>} : memref<1x16x128xf32, #tpu.memory_space<vmem>>, vector<1x16x128xf32>,
    return
  }
  func.func @transform_0(%arg0: i32) -> (i32, i32, i32) {
    %c0_i32 = arith.constant 0 : i32
    %c0_i32_0 = arith.constant 0 : i32
    %c0_i32_1 = arith.constant 0 : i32
    return %arg0, %c0_i32, %c0_i32_0 : i32, i32, i32
  }
  func.func @transform_1(%arg0: i32) -> (i32, i32) {
    %c0_i32 = arith.constant 0 : i32
    %c0_i32_0 = arith.constant 0 : i32
    %c0_i32_1 = arith.constant 0 : i32
    return %c0_i32, %c0_i32_0 : i32, i32
  }
  func.func @transform_2(%arg0: i32) -> (i32, i32) {
    %c0_i32 = arith.constant 0 : i32
    %c0_i32_0 = arith.constant 0 : i32
    %c0_i32_1 = arith.constant 0 : i32
    return %c0_i32, %c0_i32_0 : i32, i32
  }
  func.func @transform_3(%arg0: i32) -> (i32, i32) {
    %c0_i32 = arith.constant 0 : i32
    %c0_i32_0 = arith.constant 0 : i32
    %c0_i32_1 = arith.constant 0 : i32
    return %c0_i32, %c0_i32_0 : i32, i32
  }
  func.func @transform_4(%arg0: i32) -> (i32, i32) {
    %c0_i32 = arith.constant 0 : i32
    %c0_i32_0 = arith.constant 0 : i32
    %c0_i32_1 = arith.constant 0 : i32
    return %c0_i32, %c0_i32_0 : i32, i32
  }
  func.func @transform_5(%arg0: i32) -> (i32, i32) {
    %c0_i32 = arith.constant 0 : i32
    %c0_i32_0 = arith.constant 0 : i32
    %c0_i32_1 = arith.constant 0 : i32
    return %c0_i32, %c0_i32_0 : i32, i32
  }
  func.func @transform_6(%arg0: i32) -> (i32, i32) {
    %c0_i32 = arith.constant 0 : i32
    %c0_i32_0 = arith.constant 0 : i32
    %c0_i32_1 = arith.constant 0 : i32
    return %c0_i32, %c0_i32_0 : i32, i32
  }
  func.func @transform_7(%arg0: i32) -> (i32, i32) {
    %c0_i32 = arith.constant 0 : i32
    %c0_i32_0 = arith.constant 0 : i32
    %c0_i32_1 = arith.constant 0 : i32
    return %c0_i32, %c0_i32_0 : i32, i32
  }
  func.func @transform_8(%arg0: i32) -> (i32, i32) {
    %c0_i32 = arith.constant 0 : i32
    %c0_i32_0 = arith.constant 0 : i32
    %c0_i32_1 = arith.constant 0 : i32
    return %c0_i32, %c0_i32_0 : i32, i32
  }
  func.func @transform_9(%arg0: i32) -> (i32, i32) {
    %c0_i32 = arith.constant 0 : i32
    %c0_i32_0 = arith.constant 0 : i32
    %c0_i32_1 = arith.constant 0 : i32
    return %c0_i32, %c0_i32_0 : i32, i32
  }
  func.func @transform_10(%arg0: i32) -> (i32, i32) {
    %c0_i32 = arith.constant 0 : i32
    %c0_i32_0 = arith.constant 0 : i32
    %c0_i32_1 = arith.constant 0 : i32
    return %c0_i32, %c0_i32_0 : i32, i32
  }
  func.func @transform_11(%arg0: i32) -> (i32, i32) {
    %c0_i32 = arith.constant 0 : i32
    %c0_i32_0 = arith.constant 0 : i32
    %c0_i32_1 = arith.constant 0 : i32
    return %c0_i32, %c0_i32_0 : i32, i32
  }
  func.func @transform_12(%arg0: i32) -> (i32, i32) {
    %c0_i32 = arith.constant 0 : i32
    %c0_i32_0 = arith.constant 0 : i32
    %c0_i32_1 = arith.constant 0 : i32
    return %c0_i32, %c0_i32_0 : i32, i32
  }
  func.func @transform_13(%arg0: i32) -> (i32, i32) {
    %c0_i32 = arith.constant 0 : i32
    %c0_i32_0 = arith.constant 0 : i32
    %c0_i32_1 = arith.constant 0 : i32
    return %c0_i32, %c0_i32_0 : i32, i32
  }
  func.func @transform_14(%arg0: i32) -> (i32, i32) {
    %c0_i32 = arith.constant 0 : i32
    %c0_i32_0 = arith.constant 0 : i32
    %c0_i32_1 = arith.constant 0 : i32
    return %c0_i32, %c0_i32_0 : i32, i32
  }
  func.func @transform_15(%arg0: i32) -> (i32, i32) {
    %c0_i32 = arith.constant 0 : i32
    %c0_i32_0 = arith.constant 0 : i32
    %c0_i32_1 = arith.constant 0 : i32
    return %c0_i32, %c0_i32_0 : i32, i32
  }
  func.func @transform_16(%arg0: i32) -> (i32, i32) {
    %c0_i32 = arith.constant 0 : i32
    %c0_i32_0 = arith.constant 0 : i32
    %c0_i32_1 = arith.constant 0 : i32
    return %c0_i32, %c0_i32_0 : i32, i32
  }
  func.func @transform_17(%arg0: i32) -> (i32, i32) {
    %c0_i32 = arith.constant 0 : i32
    %c0_i32_0 = arith.constant 0 : i32
    %c0_i32_1 = arith.constant 0 : i32
    return %c0_i32, %c0_i32_0 : i32, i32
  }
  func.func @transform_18(%arg0: i32) -> (i32, i32, i32) {
    %c0_i32 = arith.constant 0 : i32
    %c0_i32_0 = arith.constant 0 : i32
    %c0_i32_1 = arith.constant 0 : i32
    return %arg0, %c0_i32, %c0_i32_0 : i32, i32, i32
  }
}

</mosaic_0001>

<bundles_post_ra>
// kernel: squeeze.68
= control target key start
LH: loop header
LB: loop body
LE: loop exit
PB: predicated region body
PF: predicated region fallthrough
CT: control target
= control target key end

     0   :  { %s37_s8 = smov 32   ;;  %s38_s9 = smov 64   ;;  %vm7_vm0 = vcmask 261120   ;;  %vm13_vm1 = vcmask 1048320   ;;  %vm19_vm2 = vcmask 785920   ;;  %vm25_vm3 = vcmask 523520   ;;  %s55_s0 = inlined_call_operand.vmem [shape: f32[1,4,32], index: 0, kind: input, shape index: {}]   ;;  %s56_s1 = inlined_call_operand.vmem [shape: f32[128], index: 1, kind: output, shape index: {}]  }
   0x1   :  { %v4_v0 = vld [vmem:[%s55_s0] sm:$0xf]  ;;  %s36_s0 = smov 96  }
   0x2   :  { %5 = vst [vmem:[#allocation1] sm:$0xf] %v4_v0 }
   0x9   :  { %v10_v1 = vld [vmem:[#allocation1 + $0x3] sm:$0x1]   ;;  %v22_v2 = vld [vmem:[#allocation1 + $0x1] sm:$0x1]   ;;  %v16_v3 = vld [vmem:[#allocation1 + $0x2] sm:$0x1]  }
   0xa   :  { %11 = vrot.lane.b32.xlu0 %v10_v1, %s36_s0  ;;  %23 = vrot.lane.b32.xlu1 %v22_v2, %s37_s8  ;;  %v6_v4 = vld [vmem:[#allocation1] sm:$0x1]  }
   0xb   :  { %8 = vst.msk [vmem:[#allocation0] sm:$0x1] %vm7_vm0, %v6_v4  }
  0x12   :  { %17 = vrot.lane.b32.xlu0 %v16_v3, %s38_s9 }
  0x7c   :  { %v12_v5 = vpop.permute.xlu0 %11   ;;  %v24_v6 = vpop.permute.xlu1 %23  }
  0x7d   :  { %14 = vst.msk [vmem:[#allocation0] sm:$0x1] %vm13_vm1, %v12_v5  }
  0x84   :  { %v18_v7 = vpop.permute.xlu0 %17  }
  0x85   :  { %20 = vst.msk [vmem:[#allocation0] sm:$0x1] %vm19_vm2, %v18_v7  }
  0x86   :  { %26 = vst.msk [vmem:[#allocation0] sm:$0x1] %vm25_vm3, %v24_v6  }
  0x8d   :  { %v29_v8 = vld [vmem:[#allocation0] sm:$0x1] }
  0x8e   :  { %32 = vst [vmem:[%s56_s1] sm:$0x1] %v29_v8 }

// kernel: _lambda_.4
= control target key start
LH: loop header
LB: loop body
LE: loop exit
PB: predicated region body
PF: predicated region fallthrough
CT: control target
= control target key end

     0   :  { %s415_s12 = smov 0   ;;  %s459_s0 = inlined_call_operand.vmem [shape: bf16[32,128], index: 0, kind: input, shape index: {}]   ;;  %s460_s1 = inlined_call_operand.vmem [shape: bf16[128,128], index: 1, kind: input, shape index: {}]   ;;  %s461_s2 = inlined_call_operand.vmem [shape: f32[1,128], index: 2, kind: input, shape index: {}]   ;;  %s462_s3 = inlined_call_operand.vmem [shape: f32[32,128], index: 3, kind: output, shape index: {}]  }
   0x1 LB: > { %s322_s13 = sadd.s32 4294967295, %s393_s12   ;;  %p326_p0 = scmp.ge.s32.totalorder %s393_s12, 1  ;;  %s393_s12 = sphi %s415_s12, %s13_s12  }
   0x2   : > { %p138_p1 = scmp.lt.s32.totalorder %s393_s12, 3 }
   0x4   : > { %p139_p2 = pnand %p326_p0, %p138_p1 }
   0x5   : > { %s327_s22 = sshll.u32 (!%p139_p2), %s322_s13, 1 }
   0x6   : > { %142 = sbr.rel (%p139_p2) target bundleno = 180 (0xb4), region = 32  ;;  %p163_p3 = scmp.lt.s32.totalorder (!%p139_p2), %s327_s22, 3 }
   0xb   : > { %v377_v0 = vld [vmem:[%s460_s1 + $0x38] sm:$0xff]  ;;  %v376_v1 = vld [vmem:[%s460_s1 + $0x30] sm:$0xff]  ;;  %v375_v2 = vld [vmem:[%s460_s1 + $0x28] sm:$0xff]  ;;  %s464_s22 = smov (!%p163_p3, %s327_s22), 3 }
   0xc   : > { %250 = vmatpush.bf16.msra.mxu0 %v377_v0  ;;  %v374_v3 = vld [vmem:[%s460_s1 + $0x20] sm:$0xff]  ;;  %v373_v4 = vld [vmem:[%s460_s1 + $0x18] sm:$0xff]  ;;  %v372_v5 = vld [vmem:[%s460_s1 + $0x10] sm:$0xff]  ;;  %s328_s29 = sshll.u32 %s464_s22, 2  ;;  %s330_s8 = sshll.u32 %s464_s22, 3 }
   0xd   : > { %v371_v6 = vld [vmem:[%s460_s1 + $0x8] sm:$0xff]  ;;  %v370_v7 = vld [vmem:[%s460_s1] sm:$0xff]  ;;  %s166_s7 = scalar_lea.vmem %s459_s0, %s328_s29  ;;  %s172_s14 = scalar_lea.vmem %s462_s3, %s330_s8 }
   0xe   : > { %v369_v8 = vld [vmem:[%s166_s7] sm:$0xff] }
   0xf   : > { %v386_v9 = vld [vmem:[%s461_s2] ss:$0 sm:$0xff] }
  0x10   : > { %251 = vmatpush.bf16.msra.mxu0 %v376_v1 }
  0x14   : > { %252 = vmatpush.bf16.msra.mxu0 %v375_v2 }
  0x18   : > { %253 = vmatpush.bf16.msra.mxu0 %v374_v3 }
  0x1c   : > { %254 = vmatpush.bf16.msra.mxu0 %v373_v4 }
  0x20   : > { %255 = vmatpush.bf16.msra.mxu0 %v372_v5 }
  0x24   : > { %256 = vmatpush.bf16.msra.mxu0 %v371_v6 }
  0x28   : > { %257 = vmatpush.bf16.msra.mxu0 %v370_v7 }
  0x2b   : > { %258 = vmatmul.bf16.vlgmr.msra.gmra.mxu0 %v369_v8 }
  0xa8   : > { %v259_v10 = vpop.f32.mrf.mxu0 }
  0xa9   : > { %v260_v11 = vadd.f32 %v386_v9, %v259_v10 }
  0xab   : > { %264 = vst [vmem:[%s172_s14] sm:$0xff] %v260_v11 }
  0xb0   : > { %v261_v12 = vpop.f32.mrf.mxu0 }
  0xb1   : > { %v262_v13 = vadd.f32 %v386_v9, %v261_v12 }
  0xb3   : > { %265 = vst [vmem:[%s172_s14 + $0x8] sm:$0xff] %v262_v13 }
  0xb4 PF: > { %s13_s12 = sadd.s32 1, %s393_s12  }
  0xb5   : > { %p10_p4 = scmp.ge.s32.totalorder %s13_s12, 4  }
  0xb7   :  { %12 = sbr.rel (!%p10_p4) target bundleno = 1 (0x1), region = 62 }

// kernel: _lambda_.5
= control target key start
LH: loop header
LB: loop body
LE: loop exit
PB: predicated region body
PF: predicated region fallthrough
CT: control target
= control target key end

     0   :  { %s2639_s27 = smov 0   ;;  %s3732_s0 = inlined_call_operand.vmem [shape: f32[2,16,128], index: 0, kind: input, shape index: {}]   ;;  %s3733_s1 = inlined_call_operand.vmem [shape: f32[1,128], index: 1, kind: input, shape index: {}]   ;;  %s3734_s2 = inlined_call_operand.vmem [shape: f32[1,128], index: 2, kind: input, shape index: {}]   ;;  %s3735_s3 = inlined_call_operand.vmem [shape: f32[16,16], index: 3, kind: input, shape index: {}]   ;;  %s3736_s4 = inlined_call_operand.vmem [shape: f32[16,16], index: 4, kind: input, shape index: {}]   ;;  %s3737_s5 = inlined_call_operand.vmem [shape: f32[16,16], index: 5, kind: input, shape index: {}]   ;;  %s3738_s6 = inlined_call_operand.vmem [shape: f32[16,16], index: 6, kind: input, shape index: {}]   ;;  %s3739_s7 = inlined_call_operand.vmem [shape: f32[128,256], index: 7, kind: input, shape index: {}]   ;;  %s3740_s8 = inlined_call_operand.vmem [shape: f32[128,256], index: 8, kind: input, shape index: {}]   ;;  %s3741_s9 = inlined_call_operand.vmem [shape: f32[1,256], index: 9, kind: input, shape index: {}]   ;;  %s3742_s10 = inlined_call_operand.vmem [shape: f32[256,256], index: 10, kind: input, shape index: {}]   ;;  %s3743_s11 = inlined_call_operand.vmem [shape: f32[1,256], index: 11, kind: input, shape index: {}]   ;;  %s3744_s12 = inlined_call_operand.vmem [shape: f32[1,128], index: 12, kind: input, shape index: {}]   ;;  %s3745_s13 = inlined_call_operand.vmem [shape: f32[1,128], index: 13, kind: input, shape index: {}]   ;;  %s3746_s14 = inlined_call_operand.vmem [shape: bf16[128,512], index: 14, kind: input, shape index: {}]   ;;  %s3747_s15 = inlined_call_operand.vmem [shape: f32[1,512], index: 15, kind: input, shape index: {}]   ;;  %s3748_s16 = inlined_call_operand.vmem [shape: bf16[512,128], index: 16, kind: input, shape index: {}]   ;;  %s3749_s17 = inlined_call_operand.vmem [shape: f32[1,128], index: 17, kind: input, shape index: {}]   ;;  %s3750_s18 = inlined_call_operand.vmem [shape: f32[2,16,128], index: 18, kind: output, shape index: {}]  }
   0x1   :  { %3751 = sst [smem:[#allocation2_spill]] %s3732_s0 }
   0x2   :  { %3752 = sst [smem:[#allocation3_spill]] %s3733_s1 }
   0x3   :  { %3753 = sst [smem:[#allocation4_spill]] %s3734_s2 }
   0x4 LB: > { %s2132_s28 = sadd.s32 4294967295, %s2540_s27   ;;  %p2136_p0 = scmp.ge.s32.totalorder %s2540_s27, 1  ;;  %s2540_s27 = sphi %s2639_s27, %s28_s27  }
   0x5   : > { %p512_p1 = scmp.lt.s32.totalorder %s2540_s27, 3 }
   0x7   : > { %p513_p2 = pnand %p2136_p0, %p512_p1 }
   0x8   : > { %p566_p3 = scmp.lt.s32.totalorder (!%p513_p2), %s2132_s28, 1  ;;  %s3754_s19 = sld [smem:[#allocation2_spill]] (!%p513_p2) }
   0x9   : > { %516 = sbr.rel (%p513_p2) target bundleno = 1498 (0x5da), region = 92  ;;  %s3756_s24 = sld [smem:[#allocation4_spill]] (!%p513_p2) }
   0xe   : > { %s3762_s28 = smov (!%p566_p3, %s2132_s28), 1  ;;  %v2542_v2 = vmov 128.0   ;;  %v762_v26 = vld [vmem:[%s3740_s8 + $0xf0] sm:$0xff]  ;;  %v763_v27 = vld [vmem:[%s3740_s8 + $0xf8] sm:$0xff]  ;;  %v760_v28 = vld [vmem:[%s3740_s8 + $0xe0] sm:$0xff]  ;;  %vm639_vm7 = vcmask 130048  }
   0xf   : > { %s2411_s29 = sshll.u32 %s3762_s28, 4  ;;  %2492 = vrcp.f32 %v2542_v2  ;;  %764 = vmatpush.msra.mxu2 %v762_v26  ;;  %787 = vmatpush.msra.mxu3 %v763_v27  ;;  %v761_v29 = vld [vmem:[%s3740_s8 + $0xe8] sm:$0xff]  ;;  %v758_v31 = vld [vmem:[%s3740_s8 + $0xd0] sm:$0xff]  ;;  %v759_v32 = vld [vmem:[%s3740_s8 + $0xd8] sm:$0xff] }
  0x10   : > { %s570_s1 = scalar_lea.vmem %s3754_s19, %s2411_s29  ;;  %v756_v34 = vld [vmem:[%s3740_s8 + $0xc0] sm:$0xff]  ;;  %v757_v35 = vld [vmem:[%s3740_s8 + $0xc8] sm:$0xff]  ;;  %v754_v39 = vld [vmem:[%s3740_s8 + $0xb0] sm:$0xff]  ;;  %s3755_s19 = sld [smem:[#allocation3_spill]] }
  0x11   : > { %v2655_v0 = vld [vmem:[%s570_s1 + $0x8] sm:$0xff]  ;;  %v2658_v1 = vld [vmem:[%s570_s1] sm:$0xff]  ;;  %765 = vmatpush.msra.mxu2 %v760_v28  ;;  %788 = vmatpush.msra.mxu3 %v761_v29  ;;  %v755_v40 = vld [vmem:[%s3740_s8 + $0xb8] sm:$0xff]  ;;  %s575_s23 = scalar_lea.vmem %s3750_s18, %s2411_s29 }
  0x12   : > { %580 = vadd.xlane.f32.xlu0 %v2655_v0  ;;  %v752_v44 = vld [vmem:[%s3740_s8 + $0xa0] sm:$0xff]  ;;  %v753_v45 = vld [vmem:[%s3740_s8 + $0xa8] sm:$0xff]  ;;  %v750_v49 = vld [vmem:[%s3740_s8 + $0x90] sm:$0xff] }
  0x13   : > { %766 = vmatpush.msra.mxu2 %v758_v31  ;;  %789 = vmatpush.msra.mxu3 %v759_v32  ;;  %v2488_v47 = vld [vmem:[%s3756_s24] ss:$0 sm:$0xff]  ;;  %v751_v50 = vld [vmem:[%s3740_s8 + $0x98] sm:$0xff]  ;;  %v749_v55 = vld [vmem:[%s3740_s8 + $0x88] sm:$0xff] }
  0x14   : > { %v748_v54 = vld [vmem:[%s3740_s8 + $0x80] sm:$0xff]  ;;  %v746_v57 = vld [vmem:[%s3740_s8 + $0x70] sm:$0xff]  ;;  %v747_v58 = vld [vmem:[%s3740_s8 + $0x78] sm:$0xff] }
  0x15   : > { %v2493_v3 = vpop.eup %2492  ;;  %767 = vmatpush.msra.mxu2 %v756_v34  ;;  %790 = vmatpush.msra.mxu3 %v757_v35  ;;  %v744_v61 = vld [vmem:[%s3740_s8 + $0x60] sm:$0xff]  ;;  %v745_v62 = vld [vmem:[%s3740_s8 + $0x68] sm:$0xff]  ;;  %v742_v2 = vld [vmem:[%s3740_s8 + $0x50] sm:$0xff] }
  0x16   : > { %v583_v4 = vmul.f32 128.0, %v2493_v3  ;;  %vm587_vm0 = vweird.f32 %v2493_v3  ;;  %v2487_v41 = vld [vmem:[%s3755_s19] ss:$0 sm:$0xff]  ;;  %v734_v26 = vld [vmem:[%s3740_s8 + $0x10] sm:$0xff]  ;;  %v735_v27 = vld [vmem:[%s3740_s8 + $0x18] sm:$0xff] }
  0x17   : > { %768 = vmatpush.msra.mxu2 %v754_v39  ;;  %791 = vmatpush.msra.mxu3 %v755_v40  ;;  %v720_v28 = vld [vmem:[%s3739_s7 + $0xa0] sm:$0xff]  ;;  %v721_v29 = vld [vmem:[%s3739_s7 + $0xa8] sm:$0xff]  ;;  %v719_v31 = vld [vmem:[%s3739_s7 + $0x98] sm:$0xff] }
  0x18   : > { %v584_v5 = vsub.f32 1.0, %v583_v4  ;;  %v716_v32 = vld [vmem:[%s3739_s7 + $0x80] sm:$0xff]  ;;  %v714_v34 = vld [vmem:[%s3739_s7 + $0x70] sm:$0xff]  ;;  %v715_v35 = vld [vmem:[%s3739_s7 + $0x78] sm:$0xff] }
  0x19   : > { %769 = vmatpush.msra.mxu2 %v752_v44  ;;  %792 = vmatpush.msra.mxu3 %v753_v45  ;;  %v711_v39 = vld [vmem:[%s3739_s7 + $0x58] sm:$0xff]  ;;  %v708_v40 = vld [vmem:[%s3739_s7 + $0x40] sm:$0xff]  ;;  %v706_v44 = vld [vmem:[%s3739_s7 + $0x30] sm:$0xff] }
  0x1a   : > { %578 = vadd.xlane.f32.xlu0 %v2658_v1  ;;  %v585_v6 = vmul.f32 %v2493_v3, %v584_v5  ;;  %v669_v5 = vld [vmem:[%s3736_s4] sm:$0xff]  ;;  %v707_v45 = vld [vmem:[%s3739_s7 + $0x38] sm:$0xff] }
  0x1b   : > { %770 = vmatpush.msra.mxu2 %v750_v49  ;;  %793 = vmatpush.msra.mxu3 %v751_v50  ;;  %v703_v49 = vld [vmem:[%s3739_s7 + $0x18] sm:$0xff]  ;;  %v700_v50 = vld [vmem:[%s3739_s7] sm:$0xff] }
  0x1c   : > { %v586_v7 = vadd.f32 %v2493_v3, %v585_v6  ;;  %v637_v6 = vld [vmem:[%s3735_s3] sm:$0xff] }
  0x1d   : > { %771 = vmatpush.msra.mxu2 %v748_v54  ;;  %794 = vmatpush.msra.mxu3 %v749_v55  ;;  %v932_v54 = vld [vmem:[%s3742_s10 + $0x1f0] sm:$0xff]  ;;  %v901_v55 = vld [vmem:[%s3742_s10 + $0xf8] sm:$0xff] }
  0x1e   : > { %v2661_v8 = vsel %vm587_vm0, %v2493_v3, %v586_v7  ;;  %v743_v3 = vld [vmem:[%s3740_s8 + $0x58] sm:$0xff]  ;;  %v730_v7 = vld [vmem:[%s3739_s7 + $0xf0] sm:$0xff] }
  0x1f   : > { %772 = vmatpush.msra.mxu2 %v746_v57  ;;  %795 = vmatpush.msra.mxu3 %v747_v58  ;;  %v898_v57 = vld [vmem:[%s3742_s10 + $0xe0] sm:$0xff] }
  0x20   : > { %v930_v58 = vld [vmem:[%s3742_s10 + $0x1e0] sm:$0xff] }
  0x21   : > { %773 = vmatpush.msra.mxu2 %v744_v61  ;;  %796 = vmatpush.msra.mxu3 %v745_v62  ;;  %v896_v61 = vld [vmem:[%s3742_s10 + $0xd0] sm:$0xff] }
  0x22   : > { %v928_v62 = vld [vmem:[%s3742_s10 + $0x1d0] sm:$0xff] }
  0x23   : > { %774 = vmatpush.msra.mxu2 %v742_v2  ;;  %797 = vmatpush.msra.mxu3 %v743_v3  ;;  %v929_v2 = vld [vmem:[%s3742_s10 + $0x1d8] sm:$0xff]  ;;  %v894_v3 = vld [vmem:[%s3742_s10 + $0xc0] sm:$0xff] }
  0x85   : > { %v581_v9 = vpop.xlane.xlu0 %580 }
  0x86   : > { %v590_v10 = vmul.f32 %v2661_v8, %v581_v9  ;;  %v731_v9 = vld [vmem:[%s3739_s7 + $0xf8] sm:$0xff] }
  0x88   : > { %v592_v11 = vsub.f32 %v2655_v0, %v590_v10  ;;  %v740_v10 = vld [vmem:[%s3740_s8 + $0x40] sm:$0xff] }
  0x89   : > { %775 = vmatpush.msra.mxu2 %v740_v10  ;;  %v924_v10 = vld [vmem:[%s3742_s10 + $0x1b0] sm:$0xff] }
  0x8a   : > { %v594_v12 = vmul.f32 %v592_v11, %v592_v11 }
  0x8c   : > { %597 = vadd.xlane.f32.xlu1 %v594_v12  ;;  %v728_v12 = vld [vmem:[%s3739_s7 + $0xe0] sm:$0xff] }
  0x8d   : > { %v579_v13 = vpop.xlane.xlu0 %578 }
  0x8e   : > { %v589_v14 = vmul.f32 %v2661_v8, %v579_v13  ;;  %v729_v13 = vld [vmem:[%s3739_s7 + $0xe8] sm:$0xff] }
  0x90   : > { %v2667_v15 = vsub.f32 %v2658_v1, %v589_v14  ;;  %v738_v14 = vld [vmem:[%s3740_s8 + $0x30] sm:$0xff] }
  0x91   : > { %776 = vmatpush.msra.mxu2 %v738_v14  ;;  %v922_v14 = vld [vmem:[%s3742_s10 + $0x1a0] sm:$0xff] }
  0x92   : > { %v593_v16 = vmul.f32 %v2667_v15, %v2667_v15 }
  0x94   : > { %595 = vadd.xlane.f32.xlu1 %v593_v16  ;;  %v726_v16 = vld [vmem:[%s3739_s7 + $0xd0] sm:$0xff] }
  0xff   : > { %v598_v17 = vpop.xlane.xlu1 %597 }
 0x100   : > { %v600_v18 = vmul.f32 %v598_v17, %v2661_v8  ;;  %v727_v17 = vld [vmem:[%s3739_s7 + $0xd8] sm:$0xff] }
 0x102   : > { %v602_v19 = vadd.f32 1e-06, %v600_v18  ;;  %v736_v18 = vld [vmem:[%s3740_s8 + $0x20] sm:$0xff] }
 0x103   : > { %777 = vmatpush.msra.mxu2 %v736_v18  ;;  %v920_v18 = vld [vmem:[%s3742_s10 + $0x190] sm:$0xff] }
 0x104   : > { %2494 = vrsqrt.f32 %v602_v19  ;;  %vm619_vm2 = vweird.f32 %v602_v19 }
 0x105   : > { %778 = vmatpush.msra.mxu2 %v734_v26  ;;  %v916_v26 = vld [vmem:[%s3742_s10 + $0x170] sm:$0xff] }
 0x107   : > { %v596_v20 = vpop.xlane.xlu1 %595 }
 0x108   : > { %v599_v21 = vmul.f32 %v596_v20, %v2661_v8  ;;  %v724_v20 = vld [vmem:[%s3739_s7 + $0xc0] sm:$0xff] }
 0x10a   : > { %v2495_v22 = vpop.eup %2494  ;;  %v601_v23 = vadd.f32 1e-06, %v599_v21  ;;  %v725_v21 = vld [vmem:[%s3739_s7 + $0xc8] sm:$0xff] }
 0x10b   : > { %v614_v24 = vmul.f32 %v2495_v22, %v602_v19  ;;  %vm620_vm1 = vweird.f32 %v2495_v22  ;;  %v737_v19 = vld [vmem:[%s3740_s8 + $0x28] sm:$0xff] }
 0x10c   : > { %2496 = vrsqrt.f32 %v601_v23  ;;  %vm621_vm3 = vmor %vm619_vm2, %vm620_vm1  ;;  %vm609_vm5 = vweird.f32 %v601_v23 }
 0x10d   : > { %v615_v25 = vmul.f32 %v2495_v22, %v614_v24  ;;  %v722_v24 = vld [vmem:[%s3739_s7 + $0xb0] sm:$0xff] }
 0x10f   : > { %v616_v30 = vmul.f32 0.5, %v615_v25  ;;  %v723_v25 = vld [vmem:[%s3739_s7 + $0xb8] sm:$0xff] }
 0x111   : > { %v617_v33 = vsub.f32 1.5, %v616_v30  ;;  %v718_v30 = vld [vmem:[%s3739_s7 + $0x90] sm:$0xff] }
 0x112   : > { %v2497_v36 = vpop.eup %2496 }
 0x113   : > { %v618_v37 = vmul.f32 %v2495_v22, %v617_v33  ;;  %v604_v38 = vmul.f32 %v2497_v36, %v601_v23  ;;  %vm610_vm4 = vweird.f32 %v2497_v36  ;;  %v638_v23 = vld [vmem:[%s3735_s3 + $0x8] sm:$0xff] }
 0x114   : > { %vm611_vm6 = vmor %vm609_vm5, %vm610_vm4  ;;  %v717_v33 = vld [vmem:[%s3739_s7 + $0x88] sm:$0xff] }
 0x115   : > { %v622_v42 = vsel %vm621_vm3, %v2495_v22, %v618_v37  ;;  %v605_v43 = vmul.f32 %v2497_v36, %v604_v38  ;;  %v670_v22 = vld [vmem:[%s3736_s4 + $0x8] sm:$0xff]  ;;  %v710_v38 = vld [vmem:[%s3739_s7 + $0x50] sm:$0xff] }
 0x116   : > { %v624_v46 = vmul.f32 %v622_v42, %v592_v11  ;;  %v741_v11 = vld [vmem:[%s3740_s8 + $0x48] sm:$0xff]  ;;  %v732_v42 = vld [vmem:[%s3740_s8] sm:$0xff] }
 0x117   : > { %v606_v48 = vmul.f32 0.5, %v605_v43  ;;  %798 = vmatpush.msra.mxu3 %v741_v11  ;;  %v713_v37 = vld [vmem:[%s3739_s7 + $0x68] sm:$0xff]  ;;  %779 = vmatpush.msra.mxu2 %v732_v42  ;;  %v893_v11 = vld [vmem:[%s3742_s10 + $0xb8] sm:$0xff] }
 0x118   : > { %v630_v51 = vmul.f32 %v2487_v41, %v624_v46  ;;  %v733_v43 = vld [vmem:[%s3740_s8 + $0x8] sm:$0xff]  ;;  %v704_v46 = vld [vmem:[%s3739_s7 + $0x20] sm:$0xff] }
 0x119   : > { %v607_v52 = vsub.f32 1.5, %v606_v48  ;;  %v702_v48 = vld [vmem:[%s3739_s7 + $0x10] sm:$0xff]  ;;  %v911_v42 = vld [vmem:[%s3742_s10 + $0x148] sm:$0xff] }
 0x11a   : > { %v2721_v53 = vadd.f32 %v2488_v47, %v630_v51  ;;  %v701_v51 = vld [vmem:[%s3739_s7 + $0x8] sm:$0xff] }
 0x11b   : > { %v608_v56 = vmul.f32 %v2497_v36, %v607_v52  ;;  %v900_v52 = vld [vmem:[%s3742_s10 + $0xf0] sm:$0xff] }
 0x11c   : > { %660 = vmatpush.msra.mxu0 %v2721_v53  ;;  %691 = vmatpush.msra.mxu1 %v2721_v53 }
 0x11d   : > { %v612_v59 = vsel %vm611_vm6, %v2497_v36, %v608_v56  ;;  %v712_v36 = vld [vmem:[%s3739_s7 + $0x60] sm:$0xff]  ;;  %940 = vmatpush.msrb.mxu2 %v900_v52  ;;  %v933_v56 = vld [vmem:[%s3742_s10 + $0x1f8] sm:$0xff]  ;;  %v907_v52 = vld [vmem:[%s3742_s10 + $0x128] sm:$0xff] }
 0x11e   : > { %v623_v60 = vmul.f32 %v612_v59, %v2667_v15  ;;  %v739_v15 = vld [vmem:[%s3740_s8 + $0x38] sm:$0xff]  ;;  %v899_v59 = vld [vmem:[%s3742_s10 + $0xe8] sm:$0xff] }
 0x11f   : > { %799 = vmatpush.msra.mxu3 %v739_v15  ;;  %941 = vmatpush.msrb.mxu2 %v898_v57  ;;  %v891_v15 = vld [vmem:[%s3742_s10 + $0xa8] sm:$0xff]  ;;  %v905_v57 = vld [vmem:[%s3742_s10 + $0x118] sm:$0xff] }
 0x120   : > { %v629_v63 = vmul.f32 %v2487_v41, %v623_v60  ;;  %v709_v41 = vld [vmem:[%s3739_s7 + $0x48] sm:$0xff] }
 0x121   : > { %800 = vmatpush.msra.mxu3 %v737_v19  ;;  %v931_v60 = vld [vmem:[%s3742_s10 + $0x1e8] sm:$0xff]  ;;  %942 = vmatpush.msrb.mxu2 %v896_v61  ;;  %v889_v19 = vld [vmem:[%s3742_s10 + $0x98] sm:$0xff] }
 0x122   : > { %v2750_v4 = vadd.f32 %v2488_v47, %v629_v63  ;;  %v705_v47 = vld [vmem:[%s3739_s7 + $0x28] sm:$0xff]  ;;  %v897_v63 = vld [vmem:[%s3742_s10 + $0xd8] sm:$0xff] }
 0x123   : > { %801 = vmatpush.msra.mxu3 %v735_v27  ;;  %943 = vmatpush.msrb.mxu2 %v894_v3  ;;  %v885_v27 = vld [vmem:[%s3742_s10 + $0x78] sm:$0xff]  ;;  %v903_v61 = vld [vmem:[%s3742_s10 + $0x108] sm:$0xff] }
 0x124   : > { %661 = vmatpush.msra.mxu0 %v2750_v4  ;;  %692 = vmatpush.msra.mxu1 %v2750_v4 }
 0x125   : > { %2143 = vmatmul.msk.f32.vlgmr.msra.gmra.mxu1 %vm639_vm7, %v669_v5  ;;  %2141 = vmatmul.msk.f32.vlgmr.msra.gmra.mxu0 %vm639_vm7, %v637_v6  ;;  %v926_v5 = vld [vmem:[%s3742_s10 + $0x1c0] sm:$0xff]  ;;  %v895_v6 = vld [vmem:[%s3742_s10 + $0xc8] sm:$0xff] }
 0x126   : > { %810 = vmatpush.msrb.mxu0 %v730_v7  ;;  %833 = vmatpush.msrb.mxu1 %v731_v9  ;;  %v927_v7 = vld [vmem:[%s3742_s10 + $0x1c8] sm:$0xff]  ;;  %v892_v9 = vld [vmem:[%s3742_s10 + $0xb0] sm:$0xff] }
 0x127   : > { %802 = vmatpush.msra.mxu3 %v733_v43  ;;  %944 = vmatpush.msrb.mxu2 %v892_v9 }
 0x128   : > { %811 = vmatpush.msrb.mxu0 %v728_v12  ;;  %834 = vmatpush.msrb.mxu1 %v729_v13  ;;  %v925_v12 = vld [vmem:[%s3742_s10 + $0x1b8] sm:$0xff]  ;;  %v890_v13 = vld [vmem:[%s3742_s10 + $0xa0] sm:$0xff] }
 0x129   : > { %963 = vmatpush.msrb.mxu3 %v932_v54  ;;  %945 = vmatpush.msrb.mxu2 %v890_v13  ;;  %v872_v54 = vld [vmem:[%s3742_s10 + $0x10] sm:$0xff] }
 0x12a   : > { %812 = vmatpush.msrb.mxu0 %v726_v16  ;;  %835 = vmatpush.msrb.mxu1 %v727_v17  ;;  %v923_v16 = vld [vmem:[%s3742_s10 + $0x1a8] sm:$0xff]  ;;  %v888_v17 = vld [vmem:[%s3742_s10 + $0x90] sm:$0xff] }
 0x12b   : > { %964 = vmatpush.msrb.mxu3 %v930_v58  ;;  %946 = vmatpush.msrb.mxu2 %v888_v17  ;;  %v870_v58 = vld [vmem:[%s3742_s10] sm:$0xff] }
 0x12c   : > { %813 = vmatpush.msrb.mxu0 %v724_v20  ;;  %836 = vmatpush.msrb.mxu1 %v725_v21  ;;  %v921_v20 = vld [vmem:[%s3742_s10 + $0x198] sm:$0xff]  ;;  %v886_v21 = vld [vmem:[%s3742_s10 + $0x80] sm:$0xff] }
 0x12d   : > { %2144 = vmatmul.msk.f32.gmra.mxu1 %vm639_vm7, %v670_v22  ;;  %2142 = vmatmul.msk.f32.gmra.mxu0 %vm639_vm7, %v638_v23  ;;  %v918_v22 = vld [vmem:[%s3742_s10 + $0x180] sm:$0xff]  ;;  %v887_v23 = vld [vmem:[%s3742_s10 + $0x88] sm:$0xff] }
 0x12e   : > { %814 = vmatpush.msrb.mxu0 %v722_v24  ;;  %837 = vmatpush.msrb.mxu1 %v723_v25  ;;  %v919_v24 = vld [vmem:[%s3742_s10 + $0x188] sm:$0xff]  ;;  %v884_v25 = vld [vmem:[%s3742_s10 + $0x70] sm:$0xff] }
 0x12f   : > { %965 = vmatpush.msrb.mxu3 %v928_v62  ;;  %947 = vmatpush.msrb.mxu2 %v886_v21 }
 0x130   : > { %815 = vmatpush.msrb.mxu0 %v720_v28  ;;  %838 = vmatpush.msrb.mxu1 %v721_v29  ;;  %v917_v28 = vld [vmem:[%s3742_s10 + $0x178] sm:$0xff]  ;;  %v882_v29 = vld [vmem:[%s3742_s10 + $0x60] sm:$0xff] }
 0x131   : > { %966 = vmatpush.msrb.mxu3 %v926_v5  ;;  %948 = vmatpush.msrb.mxu2 %v884_v25  ;;  %v934_v25 = vld [vmem:[%s3743_s11] sm:$0x3] }
 0x132   : > { %816 = vmatpush.msrb.mxu0 %v718_v30  ;;  %839 = vmatpush.msrb.mxu1 %v719_v31  ;;  %v914_v30 = vld [vmem:[%s3742_s10 + $0x160] sm:$0xff]  ;;  %v883_v31 = vld [vmem:[%s3742_s10 + $0x68] sm:$0xff] }
 0x133   : > { %967 = vmatpush.msrb.mxu3 %v924_v10  ;;  %949 = vmatpush.msrb.mxu2 %v882_v29 }
 0x134   : > { %817 = vmatpush.msrb.mxu0 %v716_v32  ;;  %840 = vmatpush.msrb.mxu1 %v717_v33  ;;  %v915_v32 = vld [vmem:[%s3742_s10 + $0x168] sm:$0xff]  ;;  %v880_v33 = vld [vmem:[%s3742_s10 + $0x50] sm:$0xff] }
 0x135   : > { %968 = vmatpush.msrb.mxu3 %v922_v14  ;;  %950 = vmatpush.msrb.mxu2 %v880_v33 }
 0x136   : > { %818 = vmatpush.msrb.mxu0 %v714_v34  ;;  %841 = vmatpush.msrb.mxu1 %v715_v35  ;;  %v912_v34 = vld [vmem:[%s3742_s10 + $0x150] sm:$0xff]  ;;  %v881_v35 = vld [vmem:[%s3742_s10 + $0x58] sm:$0xff] }
 0x137   : > { %969 = vmatpush.msrb.mxu3 %v920_v18 }
 0x138   : > { %819 = vmatpush.msrb.mxu0 %v712_v36  ;;  %842 = vmatpush.msrb.mxu1 %v713_v37  ;;  %v913_v36 = vld [vmem:[%s3742_s10 + $0x158] sm:$0xff] }
 0x139   : > { %970 = vmatpush.msrb.mxu3 %v918_v22 }
 0x13a   : > { %820 = vmatpush.msrb.mxu0 %v710_v38  ;;  %843 = vmatpush.msrb.mxu1 %v711_v39  ;;  %v878_v39 = vld [vmem:[%s3742_s10 + $0x40] sm:$0xff] }
 0x13b   : > { %971 = vmatpush.msrb.mxu3 %v916_v26  ;;  %951 = vmatpush.msrb.mxu2 %v878_v39  ;;  %v937_v26 = vperm.slane %v934_v25, 1 }
 0x13c   : > { %821 = vmatpush.msrb.mxu0 %v708_v40  ;;  %844 = vmatpush.msrb.mxu1 %v709_v41  ;;  %v910_v40 = vld [vmem:[%s3742_s10 + $0x140] sm:$0xff]  ;;  %v879_v41 = vld [vmem:[%s3742_s10 + $0x48] sm:$0xff] }
 0x13d   : > { %972 = vmatpush.msrb.mxu3 %v914_v30  ;;  %v936_v30 = vperm.slane %v934_v25, 0  ;;  %v2444_v25 = vld [vmem:[%s3746_s14 + $0xf4] sm:$0xf0] }
 0x13e   : > { %822 = vmatpush.msrb.mxu0 %v706_v44  ;;  %845 = vmatpush.msrb.mxu1 %v707_v45  ;;  %v876_v45 = vld [vmem:[%s3742_s10 + $0x30] sm:$0xff] }
 0x13f   : > { %973 = vmatpush.msrb.mxu3 %v912_v34  ;;  %952 = vmatpush.msrb.mxu2 %v876_v45 }
 0x140   : > { %823 = vmatpush.msrb.mxu0 %v704_v46  ;;  %846 = vmatpush.msrb.mxu1 %v705_v47  ;;  %v908_v46 = vld [vmem:[%s3742_s10 + $0x130] sm:$0xff]  ;;  %v877_v47 = vld [vmem:[%s3742_s10 + $0x38] sm:$0xff] }
 0x141   : > { %974 = vmatpush.msrb.mxu3 %v910_v40 }
 0x142   : > { %824 = vmatpush.msrb.mxu0 %v702_v48  ;;  %847 = vmatpush.msrb.mxu1 %v703_v49  ;;  %v909_v48 = vld [vmem:[%s3742_s10 + $0x138] sm:$0xff]  ;;  %v874_v49 = vld [vmem:[%s3742_s10 + $0x20] sm:$0xff] }
 0x143   : > { %975 = vmatpush.msrb.mxu3 %v908_v46  ;;  %953 = vmatpush.msrb.mxu2 %v874_v49 }
 0x144   : > { %825 = vmatpush.msrb.mxu0 %v700_v50  ;;  %848 = vmatpush.msrb.mxu1 %v701_v51  ;;  %v906_v50 = vld [vmem:[%s3742_s10 + $0x120] sm:$0xff]  ;;  %v875_v51 = vld [vmem:[%s3742_s10 + $0x28] sm:$0xff] }
 0x145   : > { %976 = vmatpush.msrb.mxu3 %v906_v50  ;;  %954 = vmatpush.msrb.mxu2 %v872_v54 }
 0x146   : > { %986 = vmatpush.msra.mxu0 %v901_v55  ;;  %1009 = vmatpush.msra.mxu1 %v933_v56  ;;  %v904_v55 = vld [vmem:[%s3742_s10 + $0x110] sm:$0xff]  ;;  %v873_v56 = vld [vmem:[%s3742_s10 + $0x18] sm:$0xff] }
 0x147   : > { %977 = vmatpush.msrb.mxu3 %v904_v55  ;;  %955 = vmatpush.msrb.mxu2 %v870_v58 }
 0x148   : > { %987 = vmatpush.msra.mxu0 %v899_v59  ;;  %1010 = vmatpush.msra.mxu1 %v931_v60  ;;  %v902_v59 = vld [vmem:[%s3742_s10 + $0x100] sm:$0xff]  ;;  %v871_v60 = vld [vmem:[%s3742_s10 + $0x8] sm:$0xff] }
 0x149   : > { %978 = vmatpush.msrb.mxu3 %v902_v59 }
 0x14a   : > { %988 = vmatpush.msra.mxu0 %v897_v63  ;;  %1011 = vmatpush.msra.mxu1 %v929_v2  ;;  %v856_v63 = vld [vmem:[%s3741_s9] sm:$0x3] }
 0x14b   : > { %v858_v3 = vperm.slane %v856_v63, 0  ;;  %v859_v5 = vperm.slane %v856_v63, 1  ;;  %v1059_v63 = vld [vmem:[%s3738_s6 + $0x8] sm:$0xff] }
 0x14c   : > { %989 = vmatpush.msra.mxu0 %v895_v6  ;;  %1012 = vmatpush.msra.mxu1 %v927_v7 }
 0x14e   : > { %990 = vmatpush.msra.mxu0 %v893_v11  ;;  %1013 = vmatpush.msra.mxu1 %v925_v12 }
 0x150   : > { %991 = vmatpush.msra.mxu0 %v891_v15  ;;  %1014 = vmatpush.msra.mxu1 %v923_v16 }
 0x152   : > { %992 = vmatpush.msra.mxu0 %v889_v19  ;;  %1015 = vmatpush.msra.mxu1 %v921_v20 }
 0x154   : > { %993 = vmatpush.msra.mxu0 %v887_v23  ;;  %1016 = vmatpush.msra.mxu1 %v919_v24 }
 0x156   : > { %994 = vmatpush.msra.mxu0 %v885_v27  ;;  %1017 = vmatpush.msra.mxu1 %v917_v28 }
 0x158   : > { %995 = vmatpush.msra.mxu0 %v883_v31  ;;  %1018 = vmatpush.msra.mxu1 %v915_v32 }
 0x15a   : > { %996 = vmatpush.msra.mxu0 %v881_v35  ;;  %1019 = vmatpush.msra.mxu1 %v913_v36 }
 0x15c   : > { %997 = vmatpush.msra.mxu0 %v879_v41  ;;  %1020 = vmatpush.msra.mxu1 %v911_v42 }
 0x15e   : > { %998 = vmatpush.msra.mxu0 %v877_v47  ;;  %1021 = vmatpush.msra.mxu1 %v909_v48 }
 0x160   : > { %999 = vmatpush.msra.mxu0 %v875_v51  ;;  %1022 = vmatpush.msra.mxu1 %v907_v52  ;;  %v1058_v52 = vld [vmem:[%s3738_s6] sm:$0xff] }
 0x162   : > { %1000 = vmatpush.msra.mxu0 %v873_v56  ;;  %1023 = vmatpush.msra.mxu1 %v905_v57 }
 0x164   : > { %1001 = vmatpush.msra.mxu0 %v871_v60  ;;  %1024 = vmatpush.msra.mxu1 %v903_v61  ;;  %v1056_v61 = vld [vmem:[%s3737_s5] sm:$0xff] }
 0x1a2   : > { %v694_v37 = vpop.f32.mrf.mxu1  ;;  %v663_v38 = vpop.f32.mrf.mxu0 }
 0x1a3   : > { %780 = vmatmul.f32.vlgmr.msra.gmra.mxu2 %v694_v37  ;;  %803 = vmatmul.f32.vlgmr.msra.gmra.mxu3 %v694_v37 }
 0x1a4   : > { %826 = vmatmul.f32.vlgmr.msrb.gmra.mxu0 %v663_v38  ;;  %849 = vmatmul.f32.vlgmr.msrb.gmra.mxu1 %v663_v38 }
 0x1aa   : > { %v697_v43 = vpop.f32.mrf.mxu1  ;;  %v666_v44 = vpop.f32.mrf.mxu0 }
 0x1ab   : > { %783 = vmatmul.f32.gmra.mxu2 %v697_v43  ;;  %806 = vmatmul.f32.gmra.mxu3 %v697_v43 }
 0x1ac   : > { %829 = vmatmul.f32.gmra.mxu0 %v666_v44  ;;  %852 = vmatmul.f32.gmra.mxu1 %v666_v44 }
 0x221   : > { %v827_v62 = vpop.f32.mrf.mxu0  ;;  %v850_v2 = vpop.f32.mrf.mxu1 }
 0x226   : > { %v781_v6 = vpop.f32.mrf.mxu2  ;;  %v804_v7 = vpop.f32.mrf.mxu3 }
 0x227   : > { %v828_v9 = vadd.f32 %v827_v62, %v781_v6  ;;  %v851_v10 = vadd.f32 %v850_v2, %v804_v7  ;;  %v1057_v2 = vld [vmem:[%s3737_s5 + $0x8] sm:$0xff] }
 0x229   : > { %v862_v11 = vadd.f32 %v858_v3, %v828_v9  ;;  %v863_v12 = vadd.f32 %v859_v5, %v851_v10  ;;  %v830_v15 = vpop.f32.mrf.mxu0  ;;  %v853_v16 = vpop.f32.mrf.mxu1 }
 0x22b   : > { %v866_v13 = vmax.f32 %v862_v11, 0.0  ;;  %v867_v14 = vmax.f32 %v863_v12, 0.0 }
 0x22d   : > { %956 = vmatmul.f32.vlgmr.msrb.gmra.mxu2 %v866_v13  ;;  %979 = vmatmul.f32.vlgmr.msrb.gmra.mxu3 %v867_v14 }
 0x22e   : > { %1002 = vmatmul.f32.vlgmr.msra.gmra.mxu0 %v866_v13  ;;  %1025 = vmatmul.f32.vlgmr.msra.gmra.mxu1 %v867_v14  ;;  %v784_v17 = vpop.f32.mrf.mxu2  ;;  %v807_v18 = vpop.f32.mrf.mxu3 }
 0x22f   : > { %v831_v19 = vadd.f32 %v830_v15, %v784_v17  ;;  %v854_v20 = vadd.f32 %v853_v16, %v807_v18 }
 0x231   : > { %v864_v21 = vadd.f32 %v858_v3, %v831_v19  ;;  %v865_v22 = vadd.f32 %v859_v5, %v854_v20  ;;  %v2267_v19 = vld [vmem:[%s3746_s14 + $0xe0] sm:$0xf]  ;;  %v2443_v20 = vld [vmem:[%s3746_s14 + $0xec] sm:$0xf0] }
 0x233   : > { %v868_v23 = vmax.f32 %v864_v21, 0.0  ;;  %v869_v24 = vmax.f32 %v865_v22, 0.0  ;;  %v2441_v21 = vld [vmem:[%s3746_s14 + $0xe4] sm:$0xf]  ;;  %v2268_v22 = vor.u32 %v2443_v20, %v2267_v19  ;;  %v2187_v20 = vld [vmem:[%s3746_s14 + $0x40] sm:$0xf] }
 0x235   : > { %959 = vmatmul.f32.gmra.mxu2 %v868_v23  ;;  %982 = vmatmul.f32.gmra.mxu3 %v869_v24 }
 0x236   : > { %1005 = vmatmul.f32.gmra.mxu0 %v868_v23  ;;  %1028 = vmatmul.f32.gmra.mxu1 %v869_v24  ;;  %v2269_v23 = vld [vmem:[%s3746_s14 + $0xf0] sm:$0xf0]  ;;  %v2275_v24 = vld [vmem:[%s3746_s14 + $0xe8] sm:$0xf] }
 0x237   : > { %1377 = vmatpush.bf16.msrb.mxu0 %v2268_v22  ;;  %v2421_v22 = vld [vmem:[%s3746_s14 + $0x44] sm:$0xf] }
 0x2ab   : > { %v1003_v27 = vpop.f32.mrf.mxu0  ;;  %v1026_v28 = vpop.f32.mrf.mxu1 }
 0x2ac   : > { %v1004_v29 = vadd.f32 %v1003_v27, %v937_v26  ;;  %v2276_v27 = vor.u32 %v2444_v25, %v2275_v24  ;;  %v2189_v24 = vld [vmem:[%s3746_s14 + $0x50] sm:$0xf0]  ;;  %v2195_v25 = vld [vmem:[%s3746_s14 + $0x48] sm:$0xf] }
 0x2ae   : > { %v1027_v33 = vadd.f32 %v1026_v28, %v1004_v29  ;;  %v2442_v28 = vld [vmem:[%s3746_s14 + $0xec] sm:$0xf]  ;;  %v2277_v29 = vld [vmem:[%s3746_s14 + $0xf8] sm:$0xf0] }
 0x2b0   : > { %v957_v31 = vpop.f32.mrf.mxu2  ;;  %v980_v32 = vpop.f32.mrf.mxu3  ;;  %v1045_v39 = vadd.f32 0.01, %v1027_v33  ;;  %vm1041_vm9 = vcmp.lt.f32.partialorder %v1027_v33, -0.01  ;;  %v2146_v46 = vadd.f32 -0.01, %v1027_v33 }
 0x2b1   : > { %v958_v35 = vadd.f32 %v957_v31, %v936_v30  ;;  %vm1033_vm11 = vcmp.gt.f32.partialorder %v1027_v33, 0.01  ;;  %v2251_v31 = vld [vmem:[%s3746_s14 + $0xc0] sm:$0xf]  ;;  %v2437_v33 = vld [vmem:[%s3746_s14 + $0xc4] sm:$0xf] }
 0x2b2   : > { %v1049_v49 = vsel %vm1041_vm9, %v1045_v39, 0.0 }
 0x2b3   : > { %v1006_v34 = vpop.f32.mrf.mxu0  ;;  %v1029_v37 = vpop.f32.mrf.mxu1  ;;  %v981_v40 = vadd.f32 %v980_v32, %v958_v35  ;;  %v1053_v55 = vsel %vm1033_vm11, %v2146_v46, %v1049_v49  ;;  %v2439_v32 = vld [vmem:[%s3746_s14 + $0xcc] sm:$0xf0]  ;;  %v2253_v35 = vld [vmem:[%s3746_s14 + $0xd0] sm:$0xf0]  ;;  %v2436_v49 = vld [vmem:[%s3746_s14 + $0xb4] sm:$0xf0] }
 0x2b4   : > { %v1007_v36 = vadd.f32 %v1006_v34, %v937_v26  ;;  %v2272_v26 = vor.u32 %v2441_v21, %v2269_v23  ;;  %v2252_v34 = vor.u32 %v2439_v32, %v2251_v31  ;;  %v2423_v21 = vld [vmem:[%s3746_s14 + $0x4c] sm:$0xf0]  ;;  %v2171_v32 = vld [vmem:[%s3746_s14 + $0x20] sm:$0xf] }
 0x2b5   : > { %v1044_v51 = vadd.f32 0.01, %v981_v40  ;;  %vm1040_vm13 = vcmp.lt.f32.partialorder %v981_v40, -0.01  ;;  %v2145_v57 = vadd.f32 -0.01, %v981_v40  ;;  %v2188_v23 = vor.u32 %v2423_v21, %v2187_v20 }
 0x2b6   : > { %v1030_v38 = vadd.f32 %v1029_v37, %v1007_v36  ;;  %vm1032_vm15 = vcmp.gt.f32.partialorder %v981_v40, 0.01  ;;  %1391 = vmatpush.bf16.msrb.mxu1 %v2272_v26  ;;  %v2259_v36 = vld [vmem:[%s3746_s14 + $0xc8] sm:$0xf]  ;;  %v2440_v37 = vld [vmem:[%s3746_s14 + $0xd4] sm:$0xf0]  ;;  %1378 = vmatpush.bf16.msrb.mxu0 %v2252_v34 }
 0x2b7   : > { %v1048_v59 = vsel %vm1040_vm13, %v1044_v51, 0.0  ;;  %v2260_v39 = vor.u32 %v2440_v37, %v2259_v36  ;;  %v2438_v40 = vld [vmem:[%s3746_s14 + $0xcc] sm:$0xf]  ;;  %v2424_v26 = vld [vmem:[%s3746_s14 + $0x54] sm:$0xf0] }
 0x2b8   : > { %v960_v41 = vpop.f32.mrf.mxu2  ;;  %v2148_v42 = vadd.f32 -0.01, %v1030_v38  ;;  %vm1043_vm8 = vcmp.lt.f32.partialorder %v1030_v38, -0.01  ;;  %v1047_v44 = vadd.f32 0.01, %v1030_v38  ;;  %v983_v45 = vpop.f32.mrf.mxu3  ;;  %v1052_v62 = vsel %vm1032_vm15, %v2145_v57, %v1048_v59 }
 0x2b9   : > { %v961_v43 = vadd.f32 %v960_v41, %v936_v30  ;;  %vm1035_vm10 = vcmp.gt.f32.partialorder %v1030_v38, 0.01  ;;  %v2280_v30 = vor.u32 %v2442_v28, %v2277_v29  ;;  %v2256_v38 = vor.u32 %v2437_v33, %v2253_v35  ;;  %v2261_v41 = vld [vmem:[%s3746_s14 + $0xd8] sm:$0xf0]  ;;  %v2431_v57 = vld [vmem:[%s3746_s14 + $0x8c] sm:$0xf0] }
 0x2ba   : > { %v1051_v48 = vsel %vm1043_vm8, %v1047_v44, 0.0  ;;  %v2435_v44 = vld [vmem:[%s3746_s14 + $0xac] sm:$0xf0]  ;;  %v2196_v28 = vor.u32 %v2424_v26, %v2195_v25  ;;  %v2422_v29 = vld [vmem:[%s3746_s14 + $0x4c] sm:$0xf] }
 0x2bb   : > { %v984_v47 = vadd.f32 %v983_v45, %v961_v43  ;;  %v1055_v50 = vsel %vm1035_vm10, %v2148_v42, %v1051_v48  ;;  %v2264_v42 = vor.u32 %v2438_v40, %v2261_v41  ;;  %1392 = vmatpush.bf16.msrb.mxu1 %v2256_v38  ;;  %v2235_v43 = vld [vmem:[%s3746_s14 + $0xa0] sm:$0xf]  ;;  %v2433_v45 = vld [vmem:[%s3746_s14 + $0xa4] sm:$0xf]  ;;  %v2243_v48 = vld [vmem:[%s3746_s14 + $0xa8] sm:$0xf] }
 0x2bc   : > { %1080 = vmatpush.msra.mxu2 %v1055_v50  ;;  %v2236_v46 = vor.u32 %v2435_v44, %v2235_v43  ;;  %v2244_v51 = vor.u32 %v2436_v49, %v2243_v48  ;;  %v2419_v33 = vld [vmem:[%s3746_s14 + $0x2c] sm:$0xf0]  ;;  %v2417_v34 = vld [vmem:[%s3746_s14 + $0x24] sm:$0xf]  ;;  %v2173_v36 = vld [vmem:[%s3746_s14 + $0x30] sm:$0xf0] }
 0x2bd   : > { %v2147_v54 = vadd.f32 -0.01, %v984_v47  ;;  %vm1042_vm12 = vcmp.lt.f32.partialorder %v984_v47, -0.01  ;;  %v1046_v56 = vadd.f32 0.01, %v984_v47  ;;  %v2172_v35 = vor.u32 %v2419_v33, %v2171_v32 }
 0x2be   : > { %1081 = vmatpush.msra.mxu2 %v1053_v55  ;;  %vm1034_vm14 = vcmp.gt.f32.partialorder %v984_v47, 0.01  ;;  %v2237_v47 = vld [vmem:[%s3746_s14 + $0xb0] sm:$0xf0]  ;;  %1379 = vmatpush.bf16.msrb.mxu0 %v2236_v46  ;;  %v2179_v37 = vld [vmem:[%s3746_s14 + $0x28] sm:$0xf]  ;;  %v2176_v40 = vor.u32 %v2417_v34, %v2173_v36 }
 0x2bf   : > { %v1050_v58 = vsel %vm1042_vm12, %v1046_v56, 0.0  ;;  %2149 = vmatmul.msk.f32.vlgmr.msra.gmra.mxu2 %vm639_vm7, %v1058_v52  ;;  %v2240_v50 = vor.u32 %v2433_v45, %v2237_v47  ;;  %v2434_v52 = vld [vmem:[%s3746_s14 + $0xac] sm:$0xf]  ;;  %v2219_v56 = vld [vmem:[%s3746_s14 + $0x80] sm:$0xf] }
 0x2c0   : > { %v1054_v60 = vsel %vm1034_vm14, %v2147_v54, %v1050_v58  ;;  %1405 = vmatpush.bf16.msrb.mxu2 %v2276_v27  ;;  %v2245_v54 = vld [vmem:[%s3746_s14 + $0xb8] sm:$0xf0]  ;;  %v2429_v58 = vld [vmem:[%s3746_s14 + $0x84] sm:$0xf]  ;;  %v2220_v59 = vor.u32 %v2431_v57, %v2219_v56  ;;  %v2192_v27 = vor.u32 %v2421_v22, %v2189_v24  ;;  %v2420_v38 = vld [vmem:[%s3746_s14 + $0x34] sm:$0xf0] }
 0x2c1   : > { %1109 = vmatpush.msra.mxu3 %v1054_v60  ;;  %v2248_v55 = vor.u32 %v2434_v52, %v2245_v54  ;;  %1393 = vmatpush.bf16.msrb.mxu1 %v2240_v50  ;;  %v2221_v60 = vld [vmem:[%s3746_s14 + $0x90] sm:$0xf0]  ;;  %v2180_v41 = vor.u32 %v2420_v38, %v2179_v37  ;;  %v2181_v43 = vld [vmem:[%s3746_s14 + $0x38] sm:$0xf0]  ;;  %v2155_v44 = vld [vmem:[%s3746_s14] sm:$0xf] }
 0x2c2   : > { %1380 = vmatpush.bf16.msrb.mxu0 %v2220_v59  ;;  %v2415_v47 = vld [vmem:[%s3746_s14 + $0xc] sm:$0xf0]  ;;  %v2413_v48 = vld [vmem:[%s3746_s14 + $0x4] sm:$0xf]  ;;  %v2157_v49 = vld [vmem:[%s3746_s14 + $0x10] sm:$0xf0] }
 0x2c3   : > { %1110 = vmatpush.msra.mxu3 %v1052_v62  ;;  %v2432_v62 = vld [vmem:[%s3746_s14 + $0x94] sm:$0xf0]  ;;  %v2156_v50 = vor.u32 %v2415_v47, %v2155_v44  ;;  %v2163_v52 = vld [vmem:[%s3746_s14 + $0x8] sm:$0xf]  ;;  %v2490_v20 = vld [vmem:[%s3745_s13] ss:$0 sm:$0xff] }
 0x2c4   : > { %2151 = vmatmul.msk.f32.vlgmr.msra.gmra.mxu3 %vm639_vm7, %v1056_v61  ;;  %1406 = vmatpush.bf16.msrb.mxu2 %v2260_v39  ;;  %v2227_v61 = vld [vmem:[%s3746_s14 + $0x88] sm:$0xf]  ;;  %v2416_v54 = vld [vmem:[%s3746_s14 + $0x14] sm:$0xf0] }
 0x2c5   : > { %1419 = vmatpush.bf16.msrb.mxu3 %v2280_v30  ;;  %v2197_v30 = vld [vmem:[%s3746_s14 + $0x58] sm:$0xf0]  ;;  %v2164_v57 = vor.u32 %v2416_v54, %v2163_v52 }
 0x2c6   : > { %v2200_v31 = vor.u32 %v2422_v29, %v2197_v30 }
 0x2c7   : > { %2150 = vmatmul.msk.f32.gmra.mxu2 %vm639_vm7, %v1059_v63  ;;  %v2224_v63 = vor.u32 %v2429_v58, %v2221_v60  ;;  %v2165_v58 = vld [vmem:[%s3746_s14 + $0x18] sm:$0xf0] }
 0x2c8   : > { %1407 = vmatpush.bf16.msrb.mxu2 %v2244_v51  ;;  %v2160_v51 = vor.u32 %v2413_v48, %v2157_v49 }
 0x2c9   : > { %1420 = vmatpush.bf16.msrb.mxu3 %v2264_v42  ;;  %1394 = vmatpush.bf16.msrb.mxu1 %v2224_v63  ;;  %v2418_v42 = vld [vmem:[%s3746_s14 + $0x2c] sm:$0xf] }
 0x2ca   : > { %v2184_v46 = vor.u32 %v2418_v42, %v2181_v43 }
 0x2cc   : > { %2152 = vmatmul.msk.f32.gmra.mxu3 %vm639_vm7, %v1057_v2  ;;  %v2228_v2 = vor.u32 %v2432_v62, %v2227_v61 }
 0x2cd   : > { %1421 = vmatpush.bf16.msrb.mxu3 %v2248_v55  ;;  %v2414_v55 = vld [vmem:[%s3746_s14 + $0xc] sm:$0xf] }
 0x2ce   : > { %1408 = vmatpush.bf16.msrb.mxu2 %v2228_v2  ;;  %v2168_v59 = vor.u32 %v2414_v55, %v2165_v58 }
 0x342   : > { %v1083_v3 = vpop.f32.mrf.mxu2 }
 0x347   : > { %v1112_v5 = vpop.f32.mrf.mxu3 }
 0x348   : > { %v1113_v6 = vadd.f32 %v1112_v5, %v1083_v3  ;;  %v2430_v3 = vld [vmem:[%s3746_s14 + $0x8c] sm:$0xf]  ;;  %v2229_v5 = vld [vmem:[%s3746_s14 + $0x98] sm:$0xf0] }
 0x34a   : > { %v1118_v7 = vadd.f32 %v1113_v6, %v2750_v4  ;;  %v1086_v10 = vpop.f32.mrf.mxu2  ;;  %v2232_v6 = vor.u32 %v2430_v3, %v2229_v5 }
 0x34c   : > { %v3112_v9 = vadd.f32 %v1118_v7, %v2658_v1  ;;  %v2203_v7 = vld [vmem:[%s3746_s14 + $0x60] sm:$0xf]  ;;  %1422 = vmatpush.bf16.msrb.mxu3 %v2232_v6 }
 0x34e   : > { %1122 = vadd.xlane.f32.xlu2 %v3112_v9 }
 0x34f   : > { %v1115_v11 = vpop.f32.mrf.mxu3 }
 0x350   : > { %v1116_v12 = vadd.f32 %v1115_v11, %v1086_v10  ;;  %v2427_v10 = vld [vmem:[%s3746_s14 + $0x6c] sm:$0xf0]  ;;  %v2425_v11 = vld [vmem:[%s3746_s14 + $0x64] sm:$0xf] }
 0x352   : > { %v1119_v13 = vadd.f32 %v1116_v12, %v2721_v53  ;;  %v2204_v12 = vor.u32 %v2427_v10, %v2203_v7 }
 0x354   : > { %v3117_v14 = vadd.f32 %v1119_v13, %v2655_v0  ;;  %v2205_v13 = vld [vmem:[%s3746_s14 + $0x70] sm:$0xf0]  ;;  %1381 = vmatpush.bf16.msrb.mxu0 %v2204_v12 }
 0x356   : > { %1124 = vadd.xlane.f32.xlu2 %v3117_v14 }
 0x358   : > { %1382 = vmatpush.bf16.msrb.mxu0 %v2188_v23 }
 0x35c   : > { %1383 = vmatpush.bf16.msrb.mxu0 %v2172_v35 }
 0x360   : > { %1384 = vmatpush.bf16.msrb.mxu0 %v2156_v50 }
 0x3c1   : > { %v1123_v15 = vpop.xlane.xlu2 %1122 }
 0x3c2   : > { %v1126_v16 = vmul.f32 %v1123_v15, %v2661_v8  ;;  %v2211_v15 = vld [vmem:[%s3746_s14 + $0x68] sm:$0xf] }
 0x3c4   : > { %v3122_v4 = vsub.f32 %v3112_v9, %v1126_v16  ;;  %v2428_v16 = vld [vmem:[%s3746_s14 + $0x74] sm:$0xf0] }
 0x3c6   : > { %v1130_v1 = vmul.f32 %v3122_v4, %v3122_v4 }
 0x3c8   : > { %1132 = vadd.xlane.f32.xlu0 %v1130_v1  ;;  %v2208_v1 = vor.u32 %v2425_v11, %v2205_v13 }
 0x3c9   : > { %v1125_v17 = vpop.xlane.xlu2 %1124 }
 0x3ca   : > { %v1127_v18 = vmul.f32 %v1125_v17, %v2661_v8  ;;  %v2212_v17 = vor.u32 %v2428_v16, %v2211_v15  ;;  %1395 = vmatpush.bf16.msrb.mxu1 %v2208_v1  ;;  %v2489_v1 = vld [vmem:[%s3744_s12] ss:$0 sm:$0xff] }
 0x3cc   : > { %v3128_v53 = vsub.f32 %v3117_v14, %v1127_v18  ;;  %v2426_v18 = vld [vmem:[%s3746_s14 + $0x6c] sm:$0xf]  ;;  %1409 = vmatpush.bf16.msrb.mxu2 %v2212_v17 }
 0x3ce   : > { %v1131_v0 = vmul.f32 %v3128_v53, %v3128_v53  ;;  %1396 = vmatpush.bf16.msrb.mxu1 %v2192_v27 }
 0x3d0   : > { %1134 = vadd.xlane.f32.xlu1 %v1131_v0  ;;  %v2213_v0 = vld [vmem:[%s3746_s14 + $0x78] sm:$0xf0]  ;;  %1410 = vmatpush.bf16.msrb.mxu2 %v2196_v28 }
 0x3d1   : > { %v2216_v19 = vor.u32 %v2426_v18, %v2213_v0 }
 0x3d2   : > { %1397 = vmatpush.bf16.msrb.mxu1 %v2176_v40 }
 0x3d3   : > { %1423 = vmatpush.bf16.msrb.mxu3 %v2216_v19 }
 0x3d4   : > { %1411 = vmatpush.bf16.msrb.mxu2 %v2180_v41 }
 0x3d6   : > { %1398 = vmatpush.bf16.msrb.mxu1 %v2160_v51 }
 0x3d7   : > { %1424 = vmatpush.bf16.msrb.mxu3 %v2200_v31 }
 0x3d8   : > { %1412 = vmatpush.bf16.msrb.mxu2 %v2164_v57 }
 0x3db   : > { %1425 = vmatpush.bf16.msrb.mxu3 %v2184_v46 }
 0x3df   : > { %1426 = vmatpush.bf16.msrb.mxu3 %v2168_v59 }
 0x43b   : > { %v1133_v39 = vpop.xlane.xlu0 %1132 }
 0x43c   : > { %v1136_v45 = vmul.f32 %v1133_v39, %v2661_v8 }
 0x43e   : > { %v1138_v56 = vadd.f32 1e-06, %v1136_v45 }
 0x440   : > { %2498 = vrsqrt.f32 %v1138_v56  ;;  %vm1146_vm1 = vweird.f32 %v1138_v56 }
 0x443   : > { %v1135_v60 = vpop.xlane.xlu1 %1134 }
 0x444   : > { %v1137_v61 = vmul.f32 %v1135_v60, %v2661_v8 }
 0x446   : > { %v2499_v62 = vpop.eup %2498  ;;  %v1139_v63 = vadd.f32 1e-06, %v1137_v61 }
 0x447   : > { %v1141_v2 = vmul.f32 %v2499_v62, %v1138_v56  ;;  %vm1147_vm0 = vweird.f32 %v2499_v62 }
 0x448   : > { %2500 = vrsqrt.f32 %v1139_v63  ;;  %vm1148_vm2 = vmor %vm1146_vm1, %vm1147_vm0  ;;  %vm1156_vm4 = vweird.f32 %v1139_v63 }
 0x449   : > { %v1142_v3 = vmul.f32 %v2499_v62, %v1141_v2 }
 0x44b   : > { %v1143_v5 = vmul.f32 0.5, %v1142_v3 }
 0x44d   : > { %v1144_v6 = vsub.f32 1.5, %v1143_v5 }
 0x44e   : > { %v2501_v7 = vpop.eup %2500 }
 0x44f   : > { %v1145_v10 = vmul.f32 %v2499_v62, %v1144_v6  ;;  %v1151_v11 = vmul.f32 %v2501_v7, %v1139_v63  ;;  %vm1157_vm3 = vweird.f32 %v2501_v7 }
 0x450   : > { %vm1158_vm5 = vmor %vm1156_vm4, %vm1157_vm3 }
 0x451   : > { %v1152_v12 = vmul.f32 %v2501_v7, %v1151_v11  ;;  %v1149_v13 = vsel %vm1148_vm2, %v2499_v62, %v1145_v10 }
 0x452   : > { %v1160_v8 = vmul.f32 %v1149_v13, %v3122_v4  ;;  %v3337_v4 = vld [vmem:[%s3747_s15] sm:$0xf] }
 0x453   : > { %v1153_v15 = vmul.f32 0.5, %v1152_v12  ;;  %v1210_v25 = vperm.slane %v3337_v4, 1  ;;  %v1211_v32 = vperm.slane %v3337_v4, 2  ;;  %v1212_v33 = vperm.slane %v3337_v4, 3 }
 0x454   : > { %v1166_v19 = vmul.f32 %v2489_v1, %v1160_v8 }
 0x455   : > { %v1154_v16 = vsub.f32 1.5, %v1153_v15 }
 0x456   : > { %v1172_v22 = vadd.f32 %v2490_v20, %v1166_v19 }
 0x457   : > { %v1155_v17 = vmul.f32 %v2501_v7, %v1154_v16 }
 0x459   : > { %v1159_v18 = vsel %vm1158_vm5, %v2501_v7, %v1155_v17 }
 0x45a   : > { %v1161_v0 = vmul.f32 %v1159_v18, %v3128_v53  ;;  %v1209_v53 = vperm.slane %v3337_v4, 0 }
 0x45c   : > { %v1167_v21 = vmul.f32 %v2489_v1, %v1161_v0 }
 0x45e   : > { %v1173_v23 = vadd.f32 %v2490_v20, %v1167_v21 }
 0x460   : > { %v1174_v24 = vpack.c.bf16 %v1173_v23, %v1172_v22 }
 0x462   : > { %1385 = vmatmul.bf16.vlgmr.msrb.gmra.mxu0 %v1174_v24  ;;  %1399 = vmatmul.bf16.vlgmr.msrb.gmra.mxu1 %v1174_v24 }
 0x463   : > { %1413 = vmatmul.bf16.vlgmr.msrb.gmra.mxu2 %v1174_v24  ;;  %1427 = vmatmul.bf16.vlgmr.msrb.gmra.mxu3 %v1174_v24 }
 0x4df   : > { %v1386_v26 = vpop.f32.mrf.mxu0  ;;  %v1400_v27 = vpop.f32.mrf.mxu1 }
 0x4e0   : > { %v3341_v28 = vadd.f32 %v1386_v26, %v1209_v53  ;;  %v3343_v29 = vadd.f32 %v1400_v27, %v1210_v25 }
 0x4e2   : > { %v3346_v30 = vmul.f32 0.70710677, %v3341_v28  ;;  %v3349_v31 = vmul.f32 0.70710677, %v3343_v29 }
 0x4e4   : > { %v3354_v34 = vand.u32 2147483647, %v3346_v30  ;;  %v3357_v35 = vand.u32 2147483647, %v3349_v31  ;;  %vm1449_vm1 = vcmp.ge.f32.partialorder %v3346_v30, 0.0 }
 0x4e6   : > { %v1473_v36 = vmul.f32 0.3275911, %v3354_v34  ;;  %v1474_v37 = vmul.f32 0.3275911, %v3357_v35  ;;  %v1414_v38 = vpop.f32.mrf.mxu2  ;;  %v1428_v39 = vpop.f32.mrf.mxu3 }
 0x4e7   : > { %v3363_v40 = vadd.f32 %v1414_v38, %v1211_v32  ;;  %v3367_v41 = vadd.f32 %v1428_v39, %v1212_v33  ;;  %v1388_v54 = vpop.f32.mrf.mxu0  ;;  %v1402_v57 = vpop.f32.mrf.mxu1 }
 0x4e8   : > { %v1481_v42 = vadd.f32 1.0, %v1473_v36  ;;  %v1482_v43 = vadd.f32 1.0, %v1474_v37  ;;  %v3388_v63 = vadd.f32 %v1388_v54, %v1209_v53  ;;  %v3390_v5 = vadd.f32 %v1402_v57, %v1210_v25 }
 0x4e9   : > { %v3370_v44 = vmul.f32 0.70710677, %v3363_v40  ;;  %v3373_v45 = vmul.f32 0.70710677, %v3367_v41 }
 0x4ea   : > { %2502 = vrcp.f32 %v1481_v42  ;;  %v1498_v59 = vand.u32 2147483647, %v1481_v42  ;;  %v1500_v60 = vand.u32 2147483648, %v1481_v42  ;;  %v1515_v3 = vand.u32 2147483648, %v1482_v43 }
 0x4eb   : > { %2504 = vrcp.f32 %v1482_v43  ;;  %v3376_v46 = vand.u32 2147483647, %v3370_v44  ;;  %v3380_v48 = vand.u32 2147483647, %v3373_v45  ;;  %v1513_v7 = vand.u32 2147483647, %v1482_v43 }
 0x4ec   : > { %vm1494_vm8 = vweird.f32 %v1481_v42  ;;  %v1501_v11 = vor.u32 1.1754944e-38, %v1500_v60  ;;  %vm1509_vm10 = vweird.f32 %v1482_v43  ;;  %v3394_v13 = vmul.f32 0.70710677, %v3388_v63 }
 0x4ed   : > { %v1475_v47 = vmul.f32 0.3275911, %v3376_v46  ;;  %v1476_v56 = vmul.f32 0.3275911, %v3380_v48  ;;  %vm1499_vm11 = vcmp.eq.f32.partialorder %v1498_v59, 8.507059e+37  ;;  %v1516_v8 = vor.u32 1.1754944e-38, %v1515_v3 }
 0x4ee   : > { %v3397_v1 = vmul.f32 0.70710677, %v3390_v5  ;;  %vm1514_vm13 = vcmp.eq.f32.partialorder %v1513_v7, 8.507059e+37  ;;  %v3407_v23 = vand.u32 2147483647, %v3394_v13  ;;  %v3440_v7 = vmul.f32 0.5, %v3343_v29 }
 0x4ef   : > { %v3382_v52 = vadd.f32 1.0, %v1475_v47  ;;  %v3386_v62 = vadd.f32 1.0, %v1476_v56 }
 0x4f0   : > { %v2503_v49 = vpop.eup %2502  ;;  %v3412_v25 = vand.u32 2147483647, %v3397_v1  ;;  %v1477_v37 = vmul.f32 0.3275911, %v3407_v23 }
 0x4f1   : > { %v2505_v50 = vpop.eup %2504  ;;  %v1490_v51 = vmul.f32 %v2503_v49, %v1481_v42  ;;  %2506 = vrcp.f32 %v3382_v52  ;;  %vm1495_vm6 = vweird.f32 %v2503_v49  ;;  %vm1524_vm15 = vweird.f32 %v3382_v52 }
 0x4f2   : > { %v1505_v55 = vmul.f32 %v2505_v50, %v1482_v43  ;;  %vm1510_vm7 = vweird.f32 %v2505_v50  ;;  %2508 = vrcp.f32 %v3386_v62  ;;  %vm1496_vm9 = vmor %vm1494_vm8, %vm1495_vm6  ;;  %v1478_v39 = vmul.f32 0.3275911, %v3412_v25 }
 0x4f3   : > { %v1491_v58 = vsub.f32 1.0, %v1490_v51  ;;  %vm1511_vm12 = vmor %vm1509_vm10, %vm1510_vm7  ;;  %v3419_v47 = vadd.f32 1.0, %v1477_v37  ;;  %v1530_v51 = vand.u32 2147483648, %v3382_v52  ;;  %v1528_v56 = vand.u32 2147483647, %v3382_v52 }
 0x4f4   : > { %v1506_v61 = vsub.f32 1.0, %v1505_v55  ;;  %v3424_v54 = vadd.f32 1.0, %v1478_v39  ;;  %v1682_v55 = vsub.f32 0.0, %v3357_v35  ;;  %v1543_v30 = vand.u32 2147483647, %v3386_v62 }
 0x4f5   : > { %v1492_v2 = vmul.f32 %v2503_v49, %v1491_v58  ;;  %2510 = vrcp.f32 %v3419_v47  ;;  %vm1529_vm2 = vcmp.eq.f32.partialorder %v1528_v56, 8.507059e+37  ;;  %vm1539_vm4 = vweird.f32 %v3386_v62 }
 0x4f6   : > { %v1507_v6 = vmul.f32 %v2505_v50, %v1506_v61  ;;  %2512 = vrcp.f32 %v3424_v54  ;;  %v1690_v3 = vmul.f32 %v1682_v55, %v3357_v35  ;;  %v1545_v35 = vand.u32 2147483648, %v3386_v62 }
 0x4f7   : > { %v1493_v10 = vadd.f32 %v2503_v49, %v1492_v2  ;;  %v2507_v15 = vpop.eup %2506  ;;  %v1531_v2 = vor.u32 1.1754944e-38, %v1530_v51  ;;  %vm1544_vm6 = vcmp.eq.f32.partialorder %v1543_v30, 8.507059e+37  ;;  %vm1554_vm8 = vweird.f32 %v3419_v47 }
 0x4f8   : > { %v1508_v12 = vadd.f32 %v2505_v50, %v1507_v6  ;;  %v1520_v0 = vmul.f32 %v2507_v15, %v3382_v52  ;;  %v3409_v24 = vpop.eup %2508  ;;  %vm1525_vm14 = vweird.f32 %v2507_v15  ;;  %v3436_v52 = vmul.f32 0.5, %v3341_v28 }
 0x4f9   : > { %v1497_v16 = vsel %vm1496_vm9, %v2503_v49, %v1493_v10  ;;  %v1535_v36 = vmul.f32 %v3409_v24, %v3386_v62  ;;  %v1681_v49 = vsub.f32 0.0, %v3354_v34  ;;  %vm1526_vm0 = vmor %vm1524_vm15, %vm1525_vm14  ;;  %vm1540_vm3 = vweird.f32 %v3409_v24 }
 0x4fa   : > { %v3399_v17 = vsel %vm1499_vm11, %v1501_v11, %v1497_v16  ;;  %v1512_v18 = vsel %vm1511_vm12, %v2505_v50, %v1508_v12  ;;  %v1521_v22 = vsub.f32 1.0, %v1520_v0  ;;  %v1416_v11 = vpop.f32.mrf.mxu2  ;;  %v3455_v0 = vmul.f32 1.442695, %v1690_v3  ;;  %vm3466_vm5 = vmor %vm1539_vm4, %vm1540_vm3 }
 0x4fb   : > { %v1609_v19 = vmul.f32 1.0614054, %v3399_v17  ;;  %v3403_v20 = vsel %vm1514_vm13, %v1516_v8, %v1512_v18  ;;  %v1536_v43 = vsub.f32 1.0, %v1535_v36  ;;  %v1689_v60 = vmul.f32 %v1681_v49, %v3354_v34  ;;  %v2511_v12 = vpop.eup %2510  ;;  %v2460_v49 = vld [vmem:[%s3748_s16 + $0x78] sm:$0xff] }
 0x4fc   : > { %v1610_v21 = vmul.f32 1.0614054, %v3403_v20  ;;  %v1522_v27 = vmul.f32 %v2507_v15, %v1521_v22  ;;  %v1550_v8 = vmul.f32 %v2511_v12, %v3419_v47  ;;  %v3453_v18 = vpop.eup %2512  ;;  %v1560_v36 = vand.u32 2147483648, %v3419_v47  ;;  %2031 = vmatpush.bf16.msra.mxu1 %v2460_v49 }
 0x4fd   : > { %v1617_v53 = vadd.f32 -1.4531521, %v1609_v19  ;;  %v1537_v59 = vmul.f32 %v3409_v24, %v1536_v43  ;;  %v1697_v16 = vmul.f32 1.442695, %v1689_v60  ;;  %v1546_v37 = vor.u32 1.1754944e-38, %v1545_v35  ;;  %v2452_v43 = vld [vmem:[%s3748_s16 + $0x38] sm:$0xff] }
 0x4fe   : > { %v1618_v26 = vadd.f32 -1.4531521, %v1610_v21  ;;  %v1523_v42 = vadd.f32 %v2507_v15, %v1522_v27  ;;  %v3461_v21 = vadd.f32 %v1416_v11, %v1211_v32  ;;  %v1551_v27 = vsub.f32 1.0, %v1550_v8  ;;  %2017 = vmatpush.bf16.msra.mxu0 %v2452_v43  ;;  %v2459_v11 = vld [vmem:[%s3748_s16 + $0x70] sm:$0xff] }
 0x4ff   : > { %v1625_v38 = vmul.f32 %v1617_v53, %v3399_v17  ;;  %v1538_v34 = vadd.f32 %v3409_v24, %v1537_v59  ;;  %v1683_v53 = vsub.f32 0.0, %v3376_v46  ;;  %v1565_v32 = vmul.f32 %v3453_v18, %v3424_v54 }
 0x500   : > { %v1626_v50 = vmul.f32 %v1618_v26, %v3403_v20  ;;  %v1527_v58 = vsel %vm1526_vm0, %v2507_v15, %v1523_v42  ;;  %v2543_v15 = vmov -1.0   ;;  %v1552_v39 = vmul.f32 %v2511_v12, %v1551_v27  ;;  %2032 = vmatpush.bf16.msra.mxu1 %v2459_v11 }
 0x501   : > { %v1633_v57 = vadd.f32 1.4214138, %v1625_v38  ;;  %v3442_v10 = vsel %vm1529_vm2, %v1531_v2, %v1527_v58  ;;  %v3449_v28 = vsel %vm1449_vm1, 1.0, %v2543_v15  ;;  %v1542_v62 = vsel %vm3466_vm5, %v3409_v24, %v1538_v34 }
 0x502   : > { %v1634_v61 = vadd.f32 1.4214138, %v1626_v50  ;;  %v1611_v19 = vmul.f32 1.0614054, %v3442_v10  ;;  %vm1555_vm7 = vweird.f32 %v2511_v12  ;;  %v1558_v42 = vand.u32 2147483647, %v3419_v47 }
 0x503   : > { %v1641_v6 = vmul.f32 %v1633_v57, %v3399_v17  ;;  %v1566_v24 = vsub.f32 1.0, %v1565_v32  ;;  %v3485_v51 = vmul.f32 0.70710677, %v3461_v21  ;;  %vm1450_vm9 = vcmp.ge.f32.partialorder %v3349_v31, 0.0  ;;  %vm1556_vm10 = vmor %vm1554_vm8, %vm1555_vm7  ;;  %v2466_v31 = vld [vmem:[%s3748_s16 + $0xa8] sm:$0xff] }
 0x504   : > { %v1642_v29 = vmul.f32 %v1634_v61, %v3403_v20  ;;  %v1619_v50 = vadd.f32 -1.4531521, %v1611_v19  ;;  %v3489_v56 = vsel %vm1544_vm6, %v1546_v37, %v1542_v62  ;;  %v1553_v57 = vadd.f32 %v2511_v12, %v1552_v39  ;;  %v2450_v39 = vld [vmem:[%s3748_s16 + $0x28] sm:$0xff] }
 0x505   : > { %v1649_v22 = vadd.f32 -0.28449672, %v1641_v6  ;;  %v1561_v58 = vor.u32 1.1754944e-38, %v1560_v36  ;;  %v1567_v59 = vmul.f32 %v3453_v18, %v1566_v24  ;;  %vm1570_vm11 = vweird.f32 %v3453_v18  ;;  %v2451_v6 = vld [vmem:[%s3748_s16 + $0x30] sm:$0xff] }
 0x506   : > { %v1650_v38 = vadd.f32 -0.28449672, %v1642_v29  ;;  %v1575_v47 = vand.u32 2147483648, %v3424_v54  ;;  %v3496_v60 = vand.u32 2147483647, %v3485_v51  ;;  %v1557_v61 = vsel %vm1556_vm10, %v2511_v12, %v1553_v57  ;;  %2018 = vmatpush.bf16.msra.mxu0 %v2451_v6  ;;  %v2467_v57 = vld [vmem:[%s3748_s16 + $0xb0] sm:$0xff] }
 0x507   : > { %v1657_v55 = vmul.f32 %v1649_v22, %v3399_v17  ;;  %vm1559_vm12 = vcmp.eq.f32.partialorder %v1558_v42, 8.507059e+37  ;;  %v1685_v2 = vsub.f32 0.0, %v3407_v23  ;;  %v1573_v3 = vand.u32 2147483647, %v3424_v54  ;;  %v2468_v22 = vld [vmem:[%s3748_s16 + $0xb8] sm:$0xff]  ;;  %v2458_v42 = vld [vmem:[%s3748_s16 + $0x68] sm:$0xff] }
 0x508   : > { %v1658_v34 = vmul.f32 %v1650_v38, %v3403_v20  ;;  %v3507_v30 = vsel %vm1559_vm12, %v1561_v58, %v1557_v61  ;;  %v1568_v35 = vadd.f32 %v3453_v18, %v1567_v59  ;;  %vm1569_vm13 = vweird.f32 %v3424_v54  ;;  %v2476_v54 = vld [vmem:[%s3748_s16 + $0xf8] sm:$0xff]  ;;  %v1430_v38 = vpop.f32.mrf.mxu3  ;;  %2045 = vmatpush.bf16.msra.mxu2 %v2468_v22  ;;  %2033 = vmatpush.bf16.msra.mxu1 %v2458_v42  ;;  %v2475_v58 = vld [vmem:[%s3748_s16 + $0xf0] sm:$0xff] }
 0x509   : > { %v1627_v12 = vmul.f32 %v1619_v50, %v3442_v10  ;;  %v1612_v29 = vmul.f32 1.0614054, %v3489_v56  ;;  %v1613_v8 = vmul.f32 1.0614054, %v3507_v30  ;;  %vm3516_vm14 = vmor %vm1569_vm13, %vm1570_vm11  ;;  %v1665_v26 = vadd.f32 0.2548296, %v1657_v55  ;;  %2059 = vmatpush.bf16.msra.mxu3 %v2476_v54 }
 0x50a   : > { %v1572_v27 = vsel %vm3516_vm14, %v3453_v18, %v1568_v35  ;;  %v1576_v36 = vor.u32 1.1754944e-38, %v1575_v47  ;;  %v1479_v62 = vmul.f32 0.3275911, %v3496_v60  ;;  %2514 = vpow2.f32 %v1697_v16  ;;  %2019 = vmatpush.bf16.msra.mxu0 %v2450_v39 }
 0x50b   : > { %v1621_v37 = vadd.f32 -1.4531521, %v1613_v8  ;;  %v1693_v32 = vmul.f32 %v1685_v2, %v3407_v23  ;;  %vm1574_vm15 = vcmp.eq.f32.partialorder %v1573_v3, 8.507059e+37  ;;  %v1666_v18 = vadd.f32 0.2548296, %v1658_v34  ;;  %v2449_v2 = vld [vmem:[%s3748_s16 + $0x20] sm:$0xff] }
 0x50c   : > { %v3537_v43 = vsel %vm1574_vm15, %v1576_v36, %v1572_v27  ;;  %v1686_v16 = vsub.f32 0.0, %v3412_v25  ;;  %v3540_v49 = vadd.f32 1.0, %v1479_v62  ;;  %v1635_v23 = vadd.f32 1.4214138, %v1627_v12  ;;  %2046 = vmatpush.bf16.msra.mxu2 %v2467_v57  ;;  %v2448_v27 = vld [vmem:[%s3748_s16 + $0x18] sm:$0xff] }
 0x50d   : > { %v1691_v50 = vmul.f32 %v1683_v53, %v3376_v46  ;;  %v1629_v24 = vmul.f32 %v1621_v37, %v3507_v30  ;;  %v1614_v55 = vmul.f32 1.0614054, %v3537_v43  ;;  %v1673_v59 = vmul.f32 %v1665_v26, %v3399_v17  ;;  %2060 = vmatpush.bf16.msra.mxu3 %v2475_v58  ;;  %v2457_v17 = vld [vmem:[%s3748_s16 + $0x60] sm:$0xff]  ;;  %v2456_v36 = vld [vmem:[%s3748_s16 + $0x58] sm:$0xff] }
 0x50e   : > { %v1620_v47 = vadd.f32 -1.4531521, %v1612_v29  ;;  %2516 = vrcp.f32 %v3540_v49  ;;  %v3557_v46 = vadd.f32 %v1430_v38, %v1212_v33  ;;  %v3569_v4 = vsel %vm1450_vm9, 1.0, %v2543_v15  ;;  %2020 = vmatpush.bf16.msra.mxu0 %v2449_v2  ;;  %2034 = vmatpush.bf16.msra.mxu1 %v2457_v17  ;;  %v2474_v29 = vld [vmem:[%s3748_s16 + $0xe8] sm:$0xff] }
 0x50f   : > { %2518 = vpow2.f32 %v3455_v0  ;;  %v1637_v53 = vadd.f32 1.4214138, %v1629_v24  ;;  %v1622_v61 = vadd.f32 -1.4531521, %v1614_v55  ;;  %v1684_v33 = vsub.f32 0.0, %v3380_v48 }
 0x510   : > { %v1705_v0 = vmul.f32 1.442695, %v1693_v32  ;;  %v1694_v3 = vmul.f32 %v1686_v16, %v3412_v25  ;;  %v2515_v6 = vpop.eup %2514  ;;  %v1643_v11 = vmul.f32 %v1635_v23, %v3442_v10  ;;  %v3574_v34 = vmul.f32 1.442695, %v1691_v50  ;;  %2047 = vmatpush.bf16.msra.mxu2 %v2466_v31  ;;  %v2465_v16 = vld [vmem:[%s3748_s16 + $0xa0] sm:$0xff] }
 0x511   : > { %v1645_v35 = vmul.f32 %v1637_v53, %v3507_v30  ;;  %v1630_v12 = vmul.f32 %v1622_v61, %v3537_v43  ;;  %v1713_v25 = vmul.f32 %v2515_v6, %v1673_v59  ;;  %v1674_v8 = vmul.f32 %v1666_v18, %v3403_v20  ;;  %2061 = vmatpush.bf16.msra.mxu3 %v2474_v29  ;;  %v2473_v23 = vld [vmem:[%s3748_s16 + $0xe0] sm:$0xff]  ;;  %v2447_v53 = vld [vmem:[%s3748_s16 + $0x10] sm:$0xff] }
 0x512   : > { %v1628_v19 = vmul.f32 %v1620_v47, %v3489_v56  ;;  %v3587_v22 = vmul.f32 0.70710677, %v3557_v46  ;;  %vm1453_vm0 = vcmp.ge.f32.partialorder %v3394_v13, 0.0  ;;  %2520 = vpow2.f32 %v1705_v0  ;;  %2021 = vmatpush.bf16.msra.mxu0 %v2448_v27  ;;  %2035 = vmatpush.bf16.msra.mxu1 %v2456_v36  ;;  %v2455_v0 = vld [vmem:[%s3748_s16 + $0x50] sm:$0xff]  ;;  %v2454_v13 = vld [vmem:[%s3748_s16 + $0x48] sm:$0xff] }
 0x513   : > { %v1653_v54 = vadd.f32 -0.28449672, %v1645_v35  ;;  %v1638_v26 = vadd.f32 1.4214138, %v1630_v12  ;;  %v1707_v20 = vmul.f32 1.442695, %v1694_v3  ;;  %vm1584_vm2 = vweird.f32 %v3540_v49 }
 0x514   : > { %v3595_v62 = vpop.eup %2516  ;;  %v3599_v37 = vand.u32 2147483647, %v3587_v22  ;;  %v1651_v38 = vadd.f32 -0.28449672, %v1643_v11  ;;  %v1721_v50 = vsub.f32 1.0, %v1713_v25  ;;  %2048 = vmatpush.bf16.msra.mxu2 %v2465_v16  ;;  %v1590_v2 = vand.u32 2147483648, %v3540_v49 }
 0x515   : > { %v2519_v32 = vpop.eup %2518  ;;  %v1661_v39 = vmul.f32 %v1653_v54, %v3507_v30  ;;  %v1646_v42 = vmul.f32 %v1638_v26, %v3537_v43  ;;  %v1580_v18 = vmul.f32 %v3595_v62, %v3540_v49  ;;  %v1636_v55 = vadd.f32 1.4214138, %v1628_v19  ;;  %2062 = vmatpush.bf16.msra.mxu3 %v2473_v23  ;;  %v2464_v35 = vld [vmem:[%s3748_s16 + $0x98] sm:$0xff] }
 0x516   : > { %v1714_v24 = vmul.f32 %v2519_v32, %v1674_v8  ;;  %v1480_v57 = vmul.f32 0.3275911, %v3599_v37  ;;  %2522 = vpow2.f32 %v1707_v20  ;;  %v1588_v61 = vand.u32 2147483647, %v3540_v49  ;;  %2022 = vmatpush.bf16.msra.mxu0 %v2447_v53  ;;  %v2472_v12 = vld [vmem:[%s3748_s16 + $0xd8] sm:$0xff]  ;;  %2036 = vmatpush.bf16.msra.mxu1 %v2455_v0 }
 0x517   : > { %v1669_v58 = vadd.f32 0.2548296, %v1661_v39  ;;  %v1654_v59 = vadd.f32 -0.28449672, %v1646_v42  ;;  %v1581_v47 = vsub.f32 1.0, %v1580_v18  ;;  %vm1585_vm1 = vweird.f32 %v3595_v62  ;;  %v2463_v39 = vld [vmem:[%s3748_s16 + $0x90] sm:$0xff] }
 0x518   : > { %v3617_v17 = vadd.f32 1.0, %v1480_v57  ;;  %v2521_v31 = vpop.eup %2520  ;;  %v1729_v29 = vmul.f32 %v1721_v50, %v3449_v28  ;;  %v1722_v25 = vsub.f32 1.0, %v1714_v24  ;;  %2049 = vmatpush.bf16.msra.mxu2 %v2464_v35  ;;  %v2446_v28 = vld [vmem:[%s3748_s16 + $0x8] sm:$0xff]  ;;  %v1659_v26 = vmul.f32 %v1651_v38, %v3442_v10  ;;  %vm1586_vm4 = vmor %vm1584_vm2, %vm1585_vm1  ;;  %v2471_v38 = vld [vmem:[%s3748_s16 + $0xd0] sm:$0xff] }
 0x519   : > { %v1677_v3 = vmul.f32 %v1669_v58, %v3507_v30  ;;  %v1662_v6 = vmul.f32 %v1654_v59, %v3537_v43  ;;  %v1582_v11 = vmul.f32 %v3595_v62, %v1581_v47  ;;  %v1461_v30 = vsel %vm1453_vm0, 1.0, %v2543_v15  ;;  %2063 = vmatpush.bf16.msra.mxu3 %v2472_v12  ;;  %v2445_v57 = vld [vmem:[%s3748_s16] sm:$0xff] }
 0x51a   : > { %2524 = vrcp.f32 %v3617_v17  ;;  %v1644_v27 = vmul.f32 %v1636_v55, %v3489_v56  ;;  %vm1454_vm3 = vcmp.ge.f32.partialorder %v3397_v1, 0.0  ;;  %v1591_v49 = vor.u32 1.1754944e-38, %v1590_v2  ;;  %2023 = vmatpush.bf16.msra.mxu0 %v2446_v28  ;;  %2037 = vmatpush.bf16.msra.mxu1 %v2454_v13  ;;  %v2469_v13 = vld [vmem:[%s3748_s16 + $0xc0] sm:$0xff] }
 0x51b   : > { %v1717_v8 = vmul.f32 %v2521_v31, %v1677_v3  ;;  %v1670_v19 = vadd.f32 0.2548296, %v1662_v6  ;;  %v1583_v54 = vadd.f32 %v3595_v62, %v1582_v11  ;;  %vm1589_vm5 = vcmp.eq.f32.partialorder %v1588_v61, 8.507059e+37  ;;  %v2462_v3 = vld [vmem:[%s3748_s16 + $0x88] sm:$0xff] }
 0x51c   : > { %v2523_v42 = vpop.eup %2522  ;;  %v1737_v18 = vadd.f32 1.0, %v1729_v29  ;;  %v1730_v16 = vmul.f32 %v1722_v25, %v3569_v4  ;;  %2050 = vmatpush.bf16.msra.mxu2 %v2463_v39  ;;  %v2453_v4 = vld [vmem:[%s3748_s16 + $0x40] sm:$0xff]  ;;  %v1667_v59 = vadd.f32 0.2548296, %v1659_v26  ;;  %2526 = vpow2.f32 %v3574_v34  ;;  %v2470_v34 = vld [vmem:[%s3748_s16 + $0xc8] sm:$0xff] }
 0x51d   : > { %v1725_v36 = vsub.f32 1.0, %v1717_v8  ;;  %v1678_v20 = vmul.f32 %v1670_v19, %v3537_v43  ;;  %v1587_v32 = vsel %vm1586_vm4, %v3595_v62, %v1583_v54  ;;  %v1687_v43 = vsub.f32 0.0, %v3496_v60  ;;  %2064 = vmatpush.bf16.msra.mxu3 %v2471_v38 }
 0x51e   : > { %v3659_v23 = vsel %vm1589_vm5, %v1591_v49, %v1587_v32  ;;  %v1437_v62 = vmul.f32 0.5, %v3388_v63  ;;  %v1438_v63 = vmul.f32 0.5, %v3390_v5  ;;  %v1462_v47 = vsel %vm1454_vm3, 1.0, %v2543_v15  ;;  %2024 = vmatpush.bf16.msra.mxu0 %v2445_v57  ;;  %2038 = vmatpush.bf16.msra.mxu1 %v2453_v4 }
 0x51f   : > { %v1733_v50 = vmul.f32 %v1725_v36, %v1461_v30  ;;  %v1718_v24 = vmul.f32 %v2523_v42, %v1678_v20  ;;  %v1615_v55 = vmul.f32 1.0614054, %v3659_v23  ;;  %v1745_v5 = vmul.f32 %v1737_v18, %v3436_v52 }
 0x520   : > { %v2525_v58 = vpop.eup %2524  ;;  %v1738_v6 = vadd.f32 1.0, %v1730_v16  ;;  %v1652_v11 = vadd.f32 -0.28449672, %v1644_v27  ;;  %v1695_v1 = vmul.f32 %v1687_v43, %v3496_v60  ;;  %2051 = vmatpush.bf16.msra.mxu2 %v2462_v3  ;;  %v1675_v25 = vmul.f32 %v1667_v59, %v3442_v10  ;;  %v2461_v60 = vld [vmem:[%s3748_s16 + $0x80] sm:$0xff] }
 0x521   : > { %v1741_v53 = vadd.f32 1.0, %v1733_v50  ;;  %v1726_v61 = vsub.f32 1.0, %v1718_v24  ;;  %v1623_v2 = vadd.f32 -1.4531521, %v1615_v55  ;;  %v1595_v0 = vmul.f32 %v2525_v58, %v3617_v17  ;;  %2065 = vmatpush.bf16.msra.mxu3 %v2470_v34 }
 0x522   : > { %vm1600_vm6 = vweird.f32 %v2525_v58  ;;  %v1603_v30 = vand.u32 2147483647, %v3617_v17  ;;  %v1605_v8 = vand.u32 2147483648, %v3617_v17  ;;  %v2527_v26 = vpop.eup %2526  ;;  %v1746_v10 = vmul.f32 %v1738_v6, %v3440_v7 }
 0x523   : > { %v1749_v35 = vmul.f32 %v1741_v53, %v1437_v62  ;;  %v1734_v12 = vmul.f32 %v1726_v61, %v1462_v47  ;;  %v1631_v31 = vmul.f32 %v1623_v2, %v3659_v23  ;;  %v1596_v29 = vsub.f32 1.0, %v1595_v0 }
 0x524   : > { %v1692_v27 = vmul.f32 %v1684_v33, %v3380_v48  ;;  %v1709_v49 = vmul.f32 1.442695, %v1695_v1  ;;  %vm1599_vm7 = vweird.f32 %v3617_v17  ;;  %2052 = vmatpush.bf16.msra.mxu2 %v2461_v60  ;;  %v1715_v39 = vmul.f32 %v2527_v26, %v1675_v25 }
 0x525   : > { %v1753_v52 = vpack.c.bf16 %v1749_v35, %v1745_v5  ;;  %v1742_v19 = vadd.f32 1.0, %v1734_v12  ;;  %v1639_v54 = vadd.f32 1.4214138, %v1631_v31  ;;  %v1597_v28 = vmul.f32 %v2525_v58, %v1596_v29  ;;  %vm1601_vm8 = vmor %vm1599_vm7, %vm1600_vm6  ;;  %2066 = vmatpush.bf16.msra.mxu3 %v2469_v13 }
 0x526   : > { %v1660_v38 = vmul.f32 %v1652_v11, %v3489_v56  ;;  %v1606_v42 = vor.u32 1.1754944e-38, %v1605_v8  ;;  %vm1604_vm9 = vcmp.eq.f32.partialorder %v1603_v30, 8.507059e+37  ;;  %v1703_v48 = vmul.f32 1.442695, %v1692_v27 }
 0x527   : > { %v1750_v36 = vmul.f32 %v1742_v19, %v1438_v63  ;;  %v1647_v20 = vmul.f32 %v1639_v54, %v3659_v23  ;;  %v1598_v32 = vadd.f32 %v2525_v58, %v1597_v28  ;;  %2025 = vmatmul.bf16.vlgmr.msra.gmra.mxu0 %v1753_v52  ;;  %2528 = vpow2.f32 %v1709_v49 }
 0x528   : > { %v1688_v43 = vsub.f32 0.0, %v3599_v37  ;;  %v1668_v50 = vadd.f32 0.2548296, %v1660_v38  ;;  %vm1451_vm10 = vcmp.ge.f32.partialorder %v3370_v44, 0.0  ;;  %v1723_v24 = vsub.f32 1.0, %v1715_v39 }
 0x529   : > { %v1754_v7 = vpack.c.bf16 %v1750_v36, %v1746_v10  ;;  %v1655_v18 = vadd.f32 -0.28449672, %v1647_v20  ;;  %v1602_v16 = vsel %vm1601_vm8, %v2525_v58, %v1598_v32  ;;  %2530 = vpow2.f32 %v1703_v48 }
 0x52a   : > { %v1607_v33 = vsel %vm1604_vm9, %v1606_v42, %v1602_v16  ;;  %v1696_v4 = vmul.f32 %v1688_v43, %v3599_v37  ;;  %v1459_v47 = vsel %vm1451_vm10, 1.0, %v2543_v15  ;;  %vm1455_vm11 = vcmp.ge.f32.partialorder %v3485_v51, 0.0 }
 0x52b   : > { %v1663_v17 = vmul.f32 %v1655_v18, %v3659_v23  ;;  %v1616_v62 = vmul.f32 1.0614054, %v1607_v33  ;;  %2039 = vmatmul.bf16.vlgmr.msra.gmra.mxu1 %v1754_v7  ;;  %v1731_v53 = vmul.f32 %v1723_v24, %v1459_v47  ;;  %v1676_v61 = vmul.f32 %v1668_v50, %v3489_v56 }
 0x52c   : > { %v1711_v44 = vmul.f32 1.442695, %v1696_v4  ;;  %v1463_v6 = vsel %vm1455_vm11, 1.0, %v2543_v15  ;;  %v1435_v35 = vmul.f32 0.5, %v3363_v40  ;;  %v1439_v51 = vmul.f32 0.5, %v3461_v21 }
 0x52d   : > { %v1671_v55 = vadd.f32 0.2548296, %v1663_v17  ;;  %v1624_v57 = vadd.f32 -1.4531521, %v1616_v62  ;;  %v2529_v63 = vpop.eup %2528  ;;  %v1739_v37 = vadd.f32 1.0, %v1731_v53  ;;  %vm1452_vm12 = vcmp.ge.f32.partialorder %v3373_v45, 0.0 }
 0x52e   : > { %2532 = vpow2.f32 %v1711_v44  ;;  %v1460_v54 = vsel %vm1452_vm12, 1.0, %v2543_v15  ;;  %vm1456_vm13 = vcmp.ge.f32.partialorder %v3587_v22, 0.0  ;;  %v1436_v45 = vmul.f32 0.5, %v3367_v41  ;;  %v2491_v22 = vld [vmem:[%s3749_s17] ss:$0 sm:$0xff] }
 0x52f   : > { %v1679_v58 = vmul.f32 %v1671_v55, %v3659_v23  ;;  %v1632_v59 = vmul.f32 %v1624_v57, %v1607_v33  ;;  %v2531_v5 = vpop.eup %2530  ;;  %v1747_v56 = vmul.f32 %v1739_v37, %v1435_v35  ;;  %v1464_v21 = vsel %vm1456_vm13, 1.0, %v2543_v15 }
 0x530   : > { %v1716_v11 = vmul.f32 %v2531_v5, %v1676_v61  ;;  %v1440_v10 = vmul.f32 0.5, %v3557_v46 }
 0x531   : > { %v1719_v2 = vmul.f32 %v2529_v63, %v1679_v58  ;;  %v1640_v0 = vadd.f32 1.4214138, %v1632_v59 }
 0x532   : > { %v1724_v29 = vsub.f32 1.0, %v1716_v11 }
 0x533   : > { %v1727_v3 = vsub.f32 1.0, %v1719_v2  ;;  %v1648_v34 = vmul.f32 %v1640_v0, %v1607_v33 }
 0x534   : > { %v2533_v19 = vpop.eup %2532  ;;  %v1732_v28 = vmul.f32 %v1724_v29, %v1460_v54 }
 0x535   : > { %v1735_v23 = vmul.f32 %v1727_v3, %v1463_v6  ;;  %v1656_v1 = vadd.f32 -0.28449672, %v1648_v34 }
 0x536   : > { %v1740_v13 = vadd.f32 1.0, %v1732_v28 }
 0x537   : > { %v1743_v12 = vadd.f32 1.0, %v1735_v23  ;;  %v1664_v31 = vmul.f32 %v1656_v1, %v1607_v33 }
 0x538   : > { %v1748_v49 = vmul.f32 %v1740_v13, %v1436_v45 }
 0x539   : > { %v1751_v25 = vmul.f32 %v1743_v12, %v1439_v51  ;;  %v1672_v30 = vadd.f32 0.2548296, %v1664_v31 }
 0x53b   : > { %v1755_v8 = vpack.c.bf16 %v1751_v25, %v1747_v56  ;;  %v1680_v52 = vmul.f32 %v1672_v30, %v1607_v33 }
 0x53d   : > { %v1720_v60 = vmul.f32 %v2533_v19, %v1680_v52  ;;  %2053 = vmatmul.bf16.vlgmr.msra.gmra.mxu2 %v1755_v8 }
 0x53f   : > { %v1728_v40 = vsub.f32 1.0, %v1720_v60 }
 0x541   : > { %v1736_v26 = vmul.f32 %v1728_v40, %v1464_v21 }
 0x543   : > { %v1744_v27 = vadd.f32 1.0, %v1736_v26 }
 0x545   : > { %v1752_v36 = vmul.f32 %v1744_v27, %v1440_v10 }
 0x547   : > { %v1756_v20 = vpack.c.bf16 %v1752_v36, %v1748_v49 }
 0x549   : > { %2067 = vmatmul.bf16.vlgmr.msra.gmra.mxu3 %v1756_v20 }
 0x5a4   : > { %v2026_v32 = vpop.f32.mrf.mxu0 }
 0x5a5   : > { %v2027_v39 = vadd.f32 %v2491_v22, %v2026_v32 }
 0x5a8   : > { %v2040_v38 = vpop.f32.mrf.mxu1 }
 0x5a9   : > { %v2041_v42 = vadd.f32 %v2040_v38, %v2027_v39 }
 0x5ac   : > { %v2028_v7 = vpop.f32.mrf.mxu0 }
 0x5ad   : > { %v2029_v41 = vadd.f32 %v2491_v22, %v2028_v7 }
 0x5b0   : > { %v2042_v48 = vpop.f32.mrf.mxu1 }
 0x5b1   : > { %v2043_v43 = vadd.f32 %v2042_v48, %v2029_v41 }
 0x5c0   : > { %v2054_v15 = vpop.f32.mrf.mxu2 }
 0x5c1   : > { %v2055_v18 = vadd.f32 %v2054_v15, %v2041_v42 }
 0x5c8   : > { %v2056_v33 = vpop.f32.mrf.mxu2 }
 0x5c9   : > { %v2057_v62 = vadd.f32 %v2056_v33, %v2043_v43 }
 0x5cc   : > { %v2068_v16 = vpop.f32.mrf.mxu3 }
 0x5cd   : > { %v2069_v46 = vadd.f32 %v2068_v16, %v2055_v18 }
 0x5cf   : > { %v2073_v17 = vadd.f32 %v2069_v46, %v3112_v9 }
 0x5d1   : > { %2075 = vst [vmem:[%s575_s23] sm:$0xff] %v2073_v17 }
 0x5d4   : > { %v2070_v50 = vpop.f32.mrf.mxu3 }
 0x5d5   : > { %v2071_v24 = vadd.f32 %v2070_v50, %v2057_v62 }
 0x5d7   : > { %v2074_v55 = vadd.f32 %v2071_v24, %v3117_v14 }
 0x5d9   : > { %2076 = vst [vmem:[%s575_s23 + $0x8] sm:$0xff] %v2074_v55 }
 0x5da PF: > { %s28_s27 = sadd.s32 1, %s2540_s27  }
 0x5db   : > { %p25_p4 = scmp.ge.s32.totalorder %s28_s27, 4  }
 0x5dd   :  { %27 = sbr.rel (!%p25_p4) target bundleno = 4 (0x4), region = 122 }

</bundles_post_ra>
